<compile_context>
chip_gen: v6e
topology: v6e:2x2x1
jax: 0.10.0
libtpu: 0.0.40
codegen_flags: <defaults>
</compile_context>

<pallas_src>
import functools

import jax
import jax.numpy as jnp
from jax import lax
from jax.experimental import pallas as pl
from jax.experimental.pallas import tpu as pltpu

EPS = 1e-5


def _bn_scale_shift(gamma, beta, mean, var):
    scale = gamma / jnp.sqrt(var + EPS)
    shift = beta - mean * scale
    return (scale.reshape(1, -1).astype(jnp.float32),
            shift.reshape(1, -1).astype(jnp.float32))


# --------------------------- fused unit kernel ------------------------------

def _unit_kernel(*refs, TH, W, H, S, cin, c0, c1, cout, cdt,
                 first_unit, last_unit, has_sc_w):
    # ---- unpack (operand list is built conditionally by the wrapper) ----
    pos = 0
    x_ref = refs[pos]; pos += 1            # (1, TH, W, cin) pipelined strip
    x_hbm = refs[pos]; pos += 1            # (N, H, W, cin) HBM ref (halo source)
    if not first_unit:
        pre_s = refs[pos]; pre_b = refs[pos + 1]; pos += 2
    w1 = refs[pos]; b1 = refs[pos + 1]; pos += 2     # bn1 scale folded into w1
    w2 = refs[pos]; b2 = refs[pos + 1]; pos += 2     # (9*c0, c1), bn2 scale folded
    w3 = refs[pos]; pos += 1
    if has_sc_w:
        wsc = refs[pos]; pos += 1
    if last_unit:
        fs = refs[pos]; fb = refs[pos + 1]; pos += 2
    o_ref = refs[pos]; pos += 1
    z1_scr = refs[pos]; pos += 1           # VMEM (TH+2, W+2, c0) f32 padded z1
    halo_buf = refs[pos]; pos += 1         # VMEM (2, W, cin)
    sem = refs[pos]                        # DMA semaphores (2,)

    n = pl.program_id(0)
    s = pl.program_id(1)
    have_top = s > 0
    have_bot = (s + 1) * TH < H            # also correct for a partial last strip

    if S > 1:
        top_row = jnp.maximum(s * TH - 1, 0)          # clamped for safe construction
        bot_row = jnp.minimum(s * TH + TH, H - 1)
        top_cp = pltpu.make_async_copy(x_hbm.at[n, pl.ds(top_row, 1)],
                                       halo_buf.at[pl.ds(0, 1)], sem.at[0])
        bot_cp = pltpu.make_async_copy(x_hbm.at[n, pl.ds(bot_row, 1)],
                                       halo_buf.at[pl.ds(1, 1)], sem.at[1])

        @pl.when(have_top)
        def _():
            top_cp.start()                 # overlaps the conv1 matmul below

        @pl.when(have_bot)
        def _():
            bot_cp.start()

    def conv1_bn_relu(rows):               # rows: (R, cin) raw input rows
        r = rows.astype(jnp.float32)
        if not first_unit:                 # fused pre-activation BN + ReLU
            r = jnp.maximum(r * pre_s[...] + pre_b[...], 0.0)
        z = jnp.dot(r.astype(cdt), w1[...], preferred_element_type=jnp.float32)
        return jnp.maximum(z + b1[...], 0.0)          # scale already in w1

    # conv1 on the main strip (raw rows are reused for the fused residual add).
    x_raw = x_ref[0].reshape(TH * W, cin)
    z1_main = conv1_bn_relu(x_raw)                    # (TH*W, c0) f32
    if H % TH != 0:
        # Partial last strip: rows below the image must be zero so the last
        # valid row's 3x3 window sees SAME padding; its own store is dropped.
        valid = H - s * TH
        rows_idx = lax.broadcasted_iota(jnp.int32, (TH * W, 1), 0) // W
        z1_main = jnp.where(rows_idx < valid, z1_main, 0.0)

    # Zero-padded z1 in VMEM: every region rewritten each step (megacore-safe),
    # no shifted full-strip copies are ever materialized.
    col0 = jnp.zeros((TH + 2, 1, c0), jnp.float32)
    z1_scr[:, pl.ds(0, 1), :] = col0
    z1_scr[:, pl.ds(W + 1, 1), :] = col0
    z1_scr[pl.ds(1, TH), pl.ds(1, W), :] = z1_main.reshape(TH, W, c0)

    if S > 1:
        @pl.when(have_top)
        def _():
            top_cp.wait()

        @pl.when(have_bot)
        def _():
            bot_cp.wait()

        # Both halo rows share one (2W, cin) matmul; the missing side (image
        # edge) is zeroed, matching SAME padding.
        zh = conv1_bn_relu(halo_buf[...].reshape(2 * W, cin)).reshape(2, W, c0)
        zt = jnp.where(have_top, zh[0], 0.0)
        zb = jnp.where(have_bot, zh[1], 0.0)
        z1_scr[pl.ds(0, 1), pl.ds(1, W), :] = zt.reshape(1, W, c0)
        z1_scr[pl.ds(TH + 1, 1), pl.ds(1, W), :] = zb.reshape(1, W, c0)
    else:
        zrow = jnp.zeros((1, W, c0), jnp.float32)
        z1_scr[pl.ds(0, 1), pl.ds(1, W), :] = zrow
        z1_scr[pl.ds(TH + 1, 1), pl.ds(1, W), :] = zrow

    # conv2 3x3 SAME as ONE im2col matmul (K = 9*c0 actually fills the MXU).
    taps = []
    for dj in range(3):
        for di in range(3):
            taps.append(z1_scr[pl.ds(di, TH), pl.ds(dj, W), :])
    lhs = jnp.concatenate(taps, axis=-1).reshape(TH * W, 9 * c0)
    z2 = jnp.dot(lhs.astype(cdt), w2[...], preferred_element_type=jnp.float32)
    z2 = jnp.maximum(z2 + b2[...], 0.0)               # scale already in w2

    # conv3 1x1 + fused residual add (+ fused final block BN/ReLU on last unit).
    out = jnp.dot(z2.astype(cdt), w3[...], preferred_element_type=jnp.float32)
    if has_sc_w:                           # unit 0 with channel-changing shortcut
        out = out + jnp.dot(x_raw.astype(cdt), wsc[...],
                            preferred_element_type=jnp.float32)
    else:                                  # identity shortcut (cin == cout)
        out = out + x_raw.astype(jnp.float32)
    if last_unit:
        out = jnp.maximum(out * fs[...] + fb[...], 0.0)
    o_ref[0] = out.reshape(TH, W, cout).astype(o_ref.dtype)


# --------------------------- tiling / VMEM plan ------------------------------

def _hw_vmem_plan():
    """(vmem_limit_bytes, need_two_grid_steps) for the local TPU generation."""
    cap = 64 * 1024 * 1024                 # conservative default (v7x per-TC)
    try:
        cap = int(getattr(pltpu.get_tpu_info(), "vmem_capacity_bytes", cap))
    except Exception:
        cap = 64 * 1024 * 1024
    if cap <= 96 * 1024 * 1024:            # v7x-class: 64 MiB, 2 TensorCores
        return max(16 * 1024 * 1024,
                   min(cap - 12 * 1024 * 1024, 48 * 1024 * 1024)), True
    # v5e / v6e: 128 MiB, single TensorCore -> one big strip is best.
    return min(cap - 24 * 1024 * 1024, 100 * 1024 * 1024), False


def _pick_tile_rows(N, H, W, cin, c0, c1, cout, act_bytes,
                    vmem_limit, need_two_steps):
    """Largest row strip whose working set fits the per-generation budget."""
    budget = int(0.55 * vmem_limit)
    LANE = 128

    def rt(v, m):
        return -(-v // m) * m

    def est(th):
        b = 2 * th * W * rt(cin, LANE) * act_bytes           # in strip (x2 buffers)
        b += 2 * th * W * rt(cout, LANE) * 4                  # out strip (x2 buffers)
        b += (th + 2) * rt(W + 2, 8) * rt(c0, LANE) * 4       # padded z1 scratch
        b += th * W * rt(9 * c0, LANE) * 4                    # im2col LHS
        b += th * W * (rt(cin, LANE) + rt(c1, LANE) + rt(cout, LANE)) * 4
        return b

    cands = sorted({H} | set(range(8, H, 8)) | {min(H, t) for t in (1, 2, 4)},
                   reverse=True)

    def ok(th):
        if est(th) > budget:
            return False
        if need_two_steps and N * pl.cdiv(H, th) < 2:
            return False                    # keep both v7x TensorCores busy
        return True

    fitting = [t for t in cands if ok(t)]
    if not fitting:
        return cands[-1]
    divisors = [t for t in fitting if H % t == 0]
    if divisors:
        return divisors[0]                  # largest divisor -> no partial strip
    return fitting[0]                       # partial last strip handled in-kernel


# --------------------------- per-unit pallas_call ----------------------------

def _fused_unit(x, unit, *, first_unit, last_unit, shortcut_w, final_bn,
                compute_dtype, out_dtype, vmem_limit, need_two_steps):
    N, H, W, cin = x.shape
    c0 = unit["w1"].shape[1]
    c1 = unit["w2"].shape[-1]
    cout = unit["w3"].shape[1]
    has_sc_w = first_unit and (shortcut_w is not None)
    cdt = compute_dtype

    TH = _pick_tile_rows(N, H, W, cin, c0, c1, cout, x.dtype.itemsize,
                         vmem_limit, need_two_steps)
    S = pl.cdiv(H, TH)

    # ---- host-side prep: fold BN scales into conv weights, cast to cdt ----
    s1, b1 = _bn_scale_shift(*unit["bn1"])
    s2, b2 = _bn_scale_shift(*unit["bn2"])
    w1f = (unit["w1"] * s1).astype(cdt)                         # (cin, c0)
    w2f = (jnp.transpose(unit["w2"], (1, 0, 2, 3))              # (dj, di, ci, co)
           .reshape(9 * c0, c1) * s2).astype(cdt)               # (9*c0, c1)
    w3f = unit["w3"].astype(cdt)

    def vec(C):
        return pl.BlockSpec((1, C), lambda n, s: (0, 0))

    def mat(a, b):
        return pl.BlockSpec((a, b), lambda n, s: (0, 0))

    operands = [x, x]
    in_specs = [pl.BlockSpec((1, TH, W, cin), lambda n, s: (n, s, 0, 0)),
                pl.BlockSpec(memory_space=pl.ANY)]
    if not first_unit:
        ps, pb = _bn_scale_shift(*unit["preact_bn"])
        operands += [ps, pb]
        in_specs += [vec(cin), vec(cin)]
    operands += [w1f, b1, w2f, b2, w3f]
    in_specs += [mat(cin, c0), vec(c0), mat(9 * c0, c1), vec(c1), mat(c1, cout)]
    if has_sc_w:
        operands += [shortcut_w.astype(cdt)]
        in_specs += [mat(cin, cout)]
    if last_unit:
        fs, fb = _bn_scale_shift(*final_bn)
        operands += [fs, fb]
        in_specs += [vec(cout), vec(cout)]

    kernel = functools.partial(
        _unit_kernel, TH=TH, W=W, H=H, S=S, cin=cin, c0=c0, c1=c1, cout=cout,
        cdt=cdt, first_unit=first_unit, last_unit=last_unit, has_sc_w=has_sc_w)

    return pl.pallas_call(
        kernel,
        out_shape=jax.ShapeDtypeStruct((N, H, W, cout), out_dtype),
        grid_spec=pltpu.PrefetchScalarGridSpec(
            num_scalar_prefetch=0,
            grid=(N, S),
            in_specs=in_specs,
            out_specs=pl.BlockSpec((1, TH, W, cout),
                                   lambda n, s: (n, s, 0, 0)),
            scratch_shapes=[pltpu.VMEM((TH + 2, W + 2, c0), jnp.float32),
                            pltpu.VMEM((2, W, cin), x.dtype),
                            pltpu.SemaphoreType.DMA((2,))]),
        compiler_params=pltpu.CompilerParams(
            dimension_semantics=("parallel", "parallel"),
            vmem_limit_bytes=int(vmem_limit)),
    )(*operands)


# ------------------------ parameters (deterministic) ------------------------

def make_params(key, in_ch, unit_ksize, unit_ch, unit_count, stride=1):
    assert len(unit_ksize) == len(unit_ch) == 3, "Unbalance Unit Info"
    assert tuple(unit_ksize) == (1, 3, 1), "kernels implement the [1,3,1] bottleneck"
    # TODO(synk): stride > 1 (strided conv2 + strided 1x1 shortcut) not implemented.
    assert stride == 1

    def bn_init(k, c):
        k1, k2, k3, k4 = jax.random.split(k, 4)
        gamma = jax.random.uniform(k1, (c,), jnp.float32, 0.5, 1.5)
        beta = 0.1 * jax.random.normal(k2, (c,), jnp.float32)
        mean = 0.1 * jax.random.normal(k3, (c,), jnp.float32)
        var = jax.random.uniform(k4, (c,), jnp.float32, 0.5, 1.5)
        return gamma, beta, mean, var

    def conv_init(k, cin, cout, ksz):           # kaiming fan_out style, HWIO
        fan_out = cout * ksz * ksz
        std = (2.0 / fan_out) ** 0.5
        return std * jax.random.normal(k, (ksz, ksz, cin, cout), jnp.float32)

    params = {"units": []}
    unit_in_ch = in_ch
    for idx in range(unit_count):
        key, *ks = jax.random.split(key, 8)
        u = {}
        if idx != 0:
            u["preact_bn"] = bn_init(ks[0], unit_in_ch)
        u["w1"] = conv_init(ks[1], unit_in_ch, unit_ch[0], 1)[0, 0]   # (Cin, C0)
        u["bn1"] = bn_init(ks[2], unit_ch[0])
        u["w2"] = conv_init(ks[3], unit_ch[0], unit_ch[1], 3)         # (3,3,C0,C1)
        u["bn2"] = bn_init(ks[4], unit_ch[1])
        u["w3"] = conv_init(ks[5], unit_ch[1], unit_ch[2], 1)[0, 0]   # (C1, C2)
        params["units"].append(u)
        unit_in_ch = unit_ch[-1]

    if in_ch != unit_ch[-1] or stride != 1:
        key, ks = jax.random.split(key)
        params["shortcut_w"] = conv_init(ks, in_ch, unit_ch[-1], 1)[0, 0]
    else:
        params["shortcut_w"] = None
    key, ks = jax.random.split(key)
    params["blk_bna_bn"] = bn_init(ks, unit_ch[-1])
    return params


# ------------------------------- forward ------------------------------------

def residual_block_forward(x_nchw, params, compute_dtype=jnp.bfloat16):
    """NCHW in, NCHW out (matches the PyTorch module, eval mode)."""
    x = jnp.transpose(x_nchw, (0, 2, 3, 1)).astype(jnp.float32)   # NCHW -> NHWC
    units = params["units"]
    n_units = len(units)
    vmem_limit, need_two_steps = _hw_vmem_plan()

    prev = x
    for idx, u in enumerate(units):
        last = idx == n_units - 1
        prev = _fused_unit(
            prev, u,
            first_unit=(idx == 0),
            last_unit=last,
            shortcut_w=params["shortcut_w"] if idx == 0 else None,
            final_bn=params["blk_bna_bn"] if last else None,
            compute_dtype=compute_dtype,
            # inter-unit activations in the compute dtype (halves HBM traffic),
            # final block output stays f32.
            out_dtype=jnp.float32 if last else compute_dtype,
            vmem_limit=vmem_limit,
            need_two_steps=need_two_steps)
    return jnp.transpose(prev, (0, 3, 1, 2))                      # NHWC -> NCHW


# ------------------------ pure-JAX reference (check) ------------------------

def residual_block_reference(x_nchw, params):
    x = jnp.transpose(x_nchw, (0, 2, 3, 1)).astype(jnp.float32)

    def bnr(t, bn):
        s, b = _bn_scale_shift(*bn)
        return jnp.maximum(t * s.reshape(1, 1, 1, -1) + b.reshape(1, 1, 1, -1), 0.0)

    def conv(t, w_hwio, pad):
        return lax.conv_general_dilated(
            t, w_hwio, window_strides=(1, 1), padding=pad,
            dimension_numbers=("NHWC", "HWIO", "NHWC"))

    if params["shortcut_w"] is not None:
        ws = params["shortcut_w"].reshape(1, 1, *params["shortcut_w"].shape)
        shortcut = conv(x, ws, "VALID")
    else:
        shortcut = x
    prev = x
    for idx, u in enumerate(params["units"]):
        new = prev
        if idx != 0:
            new = bnr(new, u["preact_bn"])
        new = conv(new, u["w1"].reshape(1, 1, *u["w1"].shape), "VALID")
        new = bnr(new, u["bn1"])
        new = conv(new, u["w2"], [(1, 1), (1, 1)])
        new = bnr(new, u["bn2"])
        new = conv(new, u["w3"].reshape(1, 1, *u["w3"].shape), "VALID")
        prev = new + shortcut
        shortcut = prev
    feat = bnr(prev, params["blk_bna_bn"])
    return jnp.transpose(feat, (0, 3, 1, 2))


if __name__ == "__main__":
    key = jax.random.PRNGKey(0)
    kx, kp = jax.random.split(key)

    N, in_ch, H, W = 2, 8, 16, 16
    unit_ksize = (1, 3, 1)
    unit_ch = (8, 8, 32)
    unit_count = 2

    x = jax.random.normal(kx, (N, in_ch, H, W), jnp.float32)   # NCHW, like PyTorch
    params = make_params(kp, in_ch, unit_ksize, unit_ch, unit_count, stride=1)

    ref = residual_block_reference(x, params)
    ref_scale = float(jnp.maximum(1.0, jnp.max(jnp.abs(ref))))

    # Strict check: f32 operands everywhere (exact same math as the reference).
    out32 = jax.block_until_ready(
        residual_block_forward(x, params, compute_dtype=jnp.float32))
    assert out32.shape == (N, unit_ch[-1], H, W), out32.shape
    err32 = float(jnp.max(jnp.abs(out32 - ref) / (1.0 + jnp.abs(ref))))
    assert err32 < 1e-3, f"f32 kernel mismatch vs reference: {err32}"

    # Fast path: bf16 matmul operands + bf16 inter-unit activations with f32
    # accumulation; tolerance scaled to the output magnitude.
    outbf = jax.block_until_ready(
        residual_block_forward(x, params, compute_dtype=jnp.bfloat16))
    errbf = float(jnp.max(jnp.abs(outbf - ref))) / ref_scale
    assert errbf < 1e-1, f"bf16 kernel mismatch vs reference: {errbf}"

    print("KERNEL_OK")
</pallas_src>

<mosaic_0001>
module attributes {stable_mosaic.version = 11 : i64} {
  func.func @_unit_kernel(%arg0: i32, %arg1: i32, %arg2: memref<1x16x16x8xf32, #tpu.memory_space<vmem>>, %arg3: memref<2x16x16x8xf32, #tpu.memory_space<any>>, %arg4: memref<8x8xf32, #tpu.memory_space<vmem>>, %arg5: memref<1x8xf32, #tpu.memory_space<vmem>>, %arg6: memref<72x8xf32, #tpu.memory_space<vmem>>, %arg7: memref<1x8xf32, #tpu.memory_space<vmem>>, %arg8: memref<8x32xf32, #tpu.memory_space<vmem>>, %arg9: memref<8x32xf32, #tpu.memory_space<vmem>>, %arg10: memref<1x16x16x32xf32, #tpu.memory_space<vmem>>, %arg11: memref<18x18x8xf32, #tpu.memory_space<vmem>>, %arg12: memref<2x16x8xf32, #tpu.memory_space<vmem>>, %arg13: memref<2x!tpu.dma_semaphore, #tpu.memory_space<semaphore_mem>>) attributes {dimension_semantics = [#tpu.dimension_semantics<parallel>, #tpu.dimension_semantics<parallel>], iteration_bounds = array<i64: 2, 1>, scalar_prefetch = 0 : i64, scratch_operands = 3 : i64, tpu.core_type = #tpu.core_type<tc>, window_params = [{transform_indices = @transform_0, window_bounds = array<i64: 1, 16, 16, 8>}, {}, {pipeline_mode = #tpu.pipeline_mode<synchronous>, transform_indices = @transform_2, window_bounds = array<i64: 8, 8>}, {pipeline_mode = #tpu.pipeline_mode<synchronous>, transform_indices = @transform_3, window_bounds = array<i64: 1, 8>}, {pipeline_mode = #tpu.pipeline_mode<synchronous>, transform_indices = @transform_4, window_bounds = array<i64: 72, 8>}, {pipeline_mode = #tpu.pipeline_mode<synchronous>, transform_indices = @transform_5, window_bounds = array<i64: 1, 8>}, {pipeline_mode = #tpu.pipeline_mode<synchronous>, transform_indices = @transform_6, window_bounds = array<i64: 8, 32>}, {pipeline_mode = #tpu.pipeline_mode<synchronous>, transform_indices = @transform_7, window_bounds = array<i64: 8, 32>}, {transform_indices = @transform_8, window_bounds = array<i64: 1, 16, 16, 32>}]} {
    %c0 = arith.constant 0 : index
    %c0_0 = arith.constant 0 : index
    %c0_1 = arith.constant 0 : index
    %c0_2 = arith.constant 0 : index
    %0 = vector.load %arg2[%c0, %c0_0, %c0_1, %c0_2] : memref<1x16x16x8xf32, #tpu.memory_space<vmem>>, vector<1x16x16x8xf32>
    %1 = vector.shape_cast %0 : vector<1x16x16x8xf32> to vector<16x16x8xf32>
    %2 = vector.shape_cast %1 : vector<16x16x8xf32> to vector<256x8xf32>
    %c0_3 = arith.constant 0 : index
    %c0_4 = arith.constant 0 : index
    %3 = vector.load %arg4[%c0_3, %c0_4] : memref<8x8xf32, #tpu.memory_space<vmem>>, vector<8x8xf32>
    %cst = arith.constant dense<0.000000e+00> : vector<256x8xf32>
    %4 = tpu.matmul %2, %3, %cst {dimension_numbers = #tpu.dot_dimension_numbers<[1], [0], [0], [1], [0, 0, 1, 1], [], []>} : vector<256x8xf32>, vector<8x8xf32>, vector<256x8xf32> -> vector<256x8xf32>
    %c0_5 = arith.constant 0 : index
    %c0_6 = arith.constant 0 : index
    %5 = vector.load %arg5[%c0_5, %c0_6] : memref<1x8xf32, #tpu.memory_space<vmem>>, vector<1x8xf32>
    %6 = vector.broadcast %5 : vector<1x8xf32> to vector<256x8xf32>
    %7 = arith.addf %4, %6 : vector<256x8xf32>
    %cst_7 = arith.constant 0.000000e+00 : f32
    %8 = vector.broadcast %cst_7 : f32 to vector<256x8xf32>
    %9 = arith.maximumf %7, %8 : vector<256x8xf32>
    %cst_8 = arith.constant 0.000000e+00 : f32
    %10 = vector.broadcast %cst_8 : f32 to vector<18x1x8xf32>
    %c0_9 = arith.constant 0 : index
    %c0_10 = arith.constant 0 : index
    %c0_11 = arith.constant 0 : index
    %11 = vector.load %arg11[%c0_9, %c0_10, %c0_11] : memref<18x18x8xf32, #tpu.memory_space<vmem>>, vector<18x1x8xf32>
    tpu.vector_store %arg11[%c0_9, %c0_10, %c0_11], %10 {strides = array<i32>} : memref<18x18x8xf32, #tpu.memory_space<vmem>>, vector<18x1x8xf32>,
    %c0_12 = arith.constant 0 : index
    %c17 = arith.constant 17 : index
    %c0_13 = arith.constant 0 : index
    %12 = vector.load %arg11[%c0_12, %c17, %c0_13] : memref<18x18x8xf32, #tpu.memory_space<vmem>>, vector<18x1x8xf32>
    tpu.vector_store %arg11[%c0_12, %c17, %c0_13], %10 {strides = array<i32>} : memref<18x18x8xf32, #tpu.memory_space<vmem>>, vector<18x1x8xf32>,
    %13 = vector.shape_cast %9 : vector<256x8xf32> to vector<16x16x8xf32>
    %c1 = arith.constant 1 : index
    %c1_14 = arith.constant 1 : index
    %c0_15 = arith.constant 0 : index
    %14 = vector.load %arg11[%c1, %c1_14, %c0_15] : memref<18x18x8xf32, #tpu.memory_space<vmem>>, vector<16x16x8xf32>
    tpu.vector_store %arg11[%c1, %c1_14, %c0_15], %13 {strides = array<i32>} : memref<18x18x8xf32, #tpu.memory_space<vmem>>, vector<16x16x8xf32>,
    %cst_16 = arith.constant 0.000000e+00 : f32
    %15 = vector.broadcast %cst_16 : f32 to vector<1x16x8xf32>
    %c0_17 = arith.constant 0 : index
    %c1_18 = arith.constant 1 : index
    %c0_19 = arith.constant 0 : index
    %16 = vector.load %arg11[%c0_17, %c1_18, %c0_19] : memref<18x18x8xf32, #tpu.memory_space<vmem>>, vector<1x16x8xf32>
    tpu.vector_store %arg11[%c0_17, %c1_18, %c0_19], %15 {strides = array<i32>} : memref<18x18x8xf32, #tpu.memory_space<vmem>>, vector<1x16x8xf32>,
    %c17_20 = arith.constant 17 : index
    %c1_21 = arith.constant 1 : index
    %c0_22 = arith.constant 0 : index
    %17 = vector.load %arg11[%c17_20, %c1_21, %c0_22] : memref<18x18x8xf32, #tpu.memory_space<vmem>>, vector<1x16x8xf32>
    tpu.vector_store %arg11[%c17_20, %c1_21, %c0_22], %15 {strides = array<i32>} : memref<18x18x8xf32, #tpu.memory_space<vmem>>, vector<1x16x8xf32>,
    %c0_23 = arith.constant 0 : index
    %c0_24 = arith.constant 0 : index
    %c0_25 = arith.constant 0 : index
    %18 = vector.load %arg11[%c0_23, %c0_24, %c0_25] : memref<18x18x8xf32, #tpu.memory_space<vmem>>, vector<16x16x8xf32>
    %c1_26 = arith.constant 1 : index
    %c0_27 = arith.constant 0 : index
    %c0_28 = arith.constant 0 : index
    %19 = vector.load %arg11[%c1_26, %c0_27, %c0_28] : memref<18x18x8xf32, #tpu.memory_space<vmem>>, vector<16x16x8xf32>
    %c2 = arith.constant 2 : index
    %c0_29 = arith.constant 0 : index
    %c0_30 = arith.constant 0 : index
    %20 = vector.load %arg11[%c2, %c0_29, %c0_30] : memref<18x18x8xf32, #tpu.memory_space<vmem>>, vector<16x16x8xf32>
    %c0_31 = arith.constant 0 : index
    %c1_32 = arith.constant 1 : index
    %c0_33 = arith.constant 0 : index
    %21 = vector.load %arg11[%c0_31, %c1_32, %c0_33] : memref<18x18x8xf32, #tpu.memory_space<vmem>>, vector<16x16x8xf32>
    %c1_34 = arith.constant 1 : index
    %c1_35 = arith.constant 1 : index
    %c0_36 = arith.constant 0 : index
    %22 = vector.load %arg11[%c1_34, %c1_35, %c0_36] : memref<18x18x8xf32, #tpu.memory_space<vmem>>, vector<16x16x8xf32>
    %c2_37 = arith.constant 2 : index
    %c1_38 = arith.constant 1 : index
    %c0_39 = arith.constant 0 : index
    %23 = vector.load %arg11[%c2_37, %c1_38, %c0_39] : memref<18x18x8xf32, #tpu.memory_space<vmem>>, vector<16x16x8xf32>
    %c0_40 = arith.constant 0 : index
    %c2_41 = arith.constant 2 : index
    %c0_42 = arith.constant 0 : index
    %24 = vector.load %arg11[%c0_40, %c2_41, %c0_42] : memref<18x18x8xf32, #tpu.memory_space<vmem>>, vector<16x16x8xf32>
    %c1_43 = arith.constant 1 : index
    %c2_44 = arith.constant 2 : index
    %c0_45 = arith.constant 0 : index
    %25 = vector.load %arg11[%c1_43, %c2_44, %c0_45] : memref<18x18x8xf32, #tpu.memory_space<vmem>>, vector<16x16x8xf32>
    %c2_46 = arith.constant 2 : index
    %c2_47 = arith.constant 2 : index
    %c0_48 = arith.constant 0 : index
    %26 = vector.load %arg11[%c2_46, %c2_47, %c0_48] : memref<18x18x8xf32, #tpu.memory_space<vmem>>, vector<16x16x8xf32>
    %27 = tpu.concatenate %18, %19, %20, %21, %22, %23, %24, %25, %26 in 2 : vector<16x16x8xf32>, vector<16x16x8xf32>, vector<16x16x8xf32>, vector<16x16x8xf32>, vector<16x16x8xf32>, vector<16x16x8xf32>, vector<16x16x8xf32>, vector<16x16x8xf32>, vector<16x16x8xf32> -> vector<16x16x72xf32>
    %28 = vector.shape_cast %27 : vector<16x16x72xf32> to vector<256x72xf32>
    %c0_49 = arith.constant 0 : index
    %c0_50 = arith.constant 0 : index
    %29 = vector.load %arg6[%c0_49, %c0_50] : memref<72x8xf32, #tpu.memory_space<vmem>>, vector<72x8xf32>
    %cst_51 = arith.constant dense<0.000000e+00> : vector<256x8xf32>
    %30 = tpu.matmul %28, %29, %cst_51 {dimension_numbers = #tpu.dot_dimension_numbers<[1], [0], [0], [1], [0, 0, 1, 1], [], []>} : vector<256x72xf32>, vector<72x8xf32>, vector<256x8xf32> -> vector<256x8xf32>
    %c0_52 = arith.constant 0 : index
    %c0_53 = arith.constant 0 : index
    %31 = vector.load %arg7[%c0_52, %c0_53] : memref<1x8xf32, #tpu.memory_space<vmem>>, vector<1x8xf32>
    %32 = vector.broadcast %31 : vector<1x8xf32> to vector<256x8xf32>
    %33 = arith.addf %30, %32 : vector<256x8xf32>
    %cst_54 = arith.constant 0.000000e+00 : f32
    %34 = vector.broadcast %cst_54 : f32 to vector<256x8xf32>
    %35 = arith.maximumf %33, %34 : vector<256x8xf32>
    %c0_55 = arith.constant 0 : index
    %c0_56 = arith.constant 0 : index
    %36 = vector.load %arg8[%c0_55, %c0_56] : memref<8x32xf32, #tpu.memory_space<vmem>>, vector<8x32xf32>
    %cst_57 = arith.constant dense<0.000000e+00> : vector<256x32xf32>
    %37 = tpu.matmul %35, %36, %cst_57 {dimension_numbers = #tpu.dot_dimension_numbers<[1], [0], [0], [1], [0, 0, 1, 1], [], []>} : vector<256x8xf32>, vector<8x32xf32>, vector<256x32xf32> -> vector<256x32xf32>
    %c0_58 = arith.constant 0 : index
    %c0_59 = arith.constant 0 : index
    %38 = vector.load %arg9[%c0_58, %c0_59] : memref<8x32xf32, #tpu.memory_space<vmem>>, vector<8x32xf32>
    %cst_60 = arith.constant dense<0.000000e+00> : vector<256x32xf32>
    %39 = tpu.matmul %2, %38, %cst_60 {dimension_numbers = #tpu.dot_dimension_numbers<[1], [0], [0], [1], [0, 0, 1, 1], [], []>} : vector<256x8xf32>, vector<8x32xf32>, vector<256x32xf32> -> vector<256x32xf32>
    %40 = arith.addf %37, %39 : vector<256x32xf32>
    %41 = vector.shape_cast %40 : vector<256x32xf32> to vector<16x16x32xf32>
    %c0_61 = arith.constant 0 : index
    %c0_62 = arith.constant 0 : index
    %c0_63 = arith.constant 0 : index
    %c0_64 = arith.constant 0 : index
    %42 = vector.load %arg10[%c0_61, %c0_62, %c0_63, %c0_64] : memref<1x16x16x32xf32, #tpu.memory_space<vmem>>, vector<1x16x16x32xf32>
    %43 = vector.shape_cast %42 : vector<1x16x16x32xf32> to vector<16x16x32xf32>
    %44 = vector.shape_cast %41 : vector<16x16x32xf32> to vector<1x16x16x32xf32>
    tpu.vector_store %arg10[%c0_61, %c0_62, %c0_63, %c0_64], %44 {strides = array<i32>} : memref<1x16x16x32xf32, #tpu.memory_space<vmem>>, vector<1x16x16x32xf32>,
    return
  }
  func.func @transform_0(%arg0: i32, %arg1: i32) -> (i32, i32, i32, i32) {
    %c0_i32 = arith.constant 0 : i32
    %c0_i32_0 = arith.constant 0 : i32
    %c0_i32_1 = arith.constant 0 : i32
    return %arg0, %arg1, %c0_i32, %c0_i32_0 : i32, i32, i32, i32
  }
  func.func @transform_2(%arg0: i32, %arg1: i32) -> (i32, i32) {
    %c0_i32 = arith.constant 0 : i32
    %c0_i32_0 = arith.constant 0 : i32
    %c0_i32_1 = arith.constant 0 : i32
    return %c0_i32, %c0_i32_0 : i32, i32
  }
  func.func @transform_3(%arg0: i32, %arg1: i32) -> (i32, i32) {
    %c0_i32 = arith.constant 0 : i32
    %c0_i32_0 = arith.constant 0 : i32
    %c0_i32_1 = arith.constant 0 : i32
    return %c0_i32, %c0_i32_0 : i32, i32
  }
  func.func @transform_4(%arg0: i32, %arg1: i32) -> (i32, i32) {
    %c0_i32 = arith.constant 0 : i32
    %c0_i32_0 = arith.constant 0 : i32
    %c0_i32_1 = arith.constant 0 : i32
    return %c0_i32, %c0_i32_0 : i32, i32
  }
  func.func @transform_5(%arg0: i32, %arg1: i32) -> (i32, i32) {
    %c0_i32 = arith.constant 0 : i32
    %c0_i32_0 = arith.constant 0 : i32
    %c0_i32_1 = arith.constant 0 : i32
    return %c0_i32, %c0_i32_0 : i32, i32
  }
  func.func @transform_6(%arg0: i32, %arg1: i32) -> (i32, i32) {
    %c0_i32 = arith.constant 0 : i32
    %c0_i32_0 = arith.constant 0 : i32
    %c0_i32_1 = arith.constant 0 : i32
    return %c0_i32, %c0_i32_0 : i32, i32
  }
  func.func @transform_7(%arg0: i32, %arg1: i32) -> (i32, i32) {
    %c0_i32 = arith.constant 0 : i32
    %c0_i32_0 = arith.constant 0 : i32
    %c0_i32_1 = arith.constant 0 : i32
    return %c0_i32, %c0_i32_0 : i32, i32
  }
  func.func @transform_8(%arg0: i32, %arg1: i32) -> (i32, i32, i32, i32) {
    %c0_i32 = arith.constant 0 : i32
    %c0_i32_0 = arith.constant 0 : i32
    %c0_i32_1 = arith.constant 0 : i32
    return %arg0, %arg1, %c0_i32, %c0_i32_0 : i32, i32, i32, i32
  }
}

</mosaic_0001>

<bundles_post_ra>
// kernel: tpu_custom_call.1
= control target key start
LH: loop header
LB: loop body
LE: loop exit
PB: predicated region body
PF: predicated region fallthrough
CT: control target
= control target key end

     0   :  { %13 = vsyncpa [#allocation6], 0  ;;  %s5861_s0 = inlined_call_operand.vmem [shape: f32[2,16,16,8], index: 0, kind: input, shape index: {}]   ;;  %s5862_s1 = inlined_call_operand.vmem [shape: f32[2,16,16,8], index: 1, kind: input, shape index: {}]   ;;  %s5863_s2 = inlined_call_operand.vmem [shape: f32[8,8], index: 2, kind: input, shape index: {}]   ;;  %s5864_s3 = inlined_call_operand.vmem [shape: f32[1,8], index: 3, kind: input, shape index: {}]   ;;  %s5865_s4 = inlined_call_operand.vmem [shape: f32[72,8], index: 4, kind: input, shape index: {}]   ;;  %s5866_s5 = inlined_call_operand.vmem [shape: f32[1,8], index: 5, kind: input, shape index: {}]   ;;  %s5867_s6 = inlined_call_operand.vmem [shape: f32[8,32], index: 6, kind: input, shape index: {}]   ;;  %s5868_s7 = inlined_call_operand.vmem [shape: f32[8,32], index: 7, kind: input, shape index: {}]   ;;  %s5869_s8 = inlined_call_operand.hbm [shape: f32[2,16,16,32], index: 8, kind: output, shape index: {}]  }
   0x1   :  { %15 = vsyncpa [#allocation6 + $0x1], 0  ;;  %s4170_s26 = smov 0   ;;  %s4172_s27 = smov 0  }
   0x2   :  { %s4174_s28 = smov 0   ;;  %s4176_s29 = smov 0  }
   0x3   :  { %s4178_s30 = smov 0   ;;  %s4180_s9 = smov 0  }
   0x4 LB: > { %s3419_s10 = sadd.s32 4294967295, %s4112_s9   ;;  %s3420_s11 = sadd.s32 4294967294, %s4112_s9   ;;  %s4112_s9 = sphi %s4180_s9, %s21_s9   ;;  %s4108_s30 = sphi %s4178_s30, %s5876_s30   ;;  %s4104_s29 = sphi %s4176_s29, %s5875_s29   ;;  %s4100_s28 = sphi %s4174_s28, %s5874_s28   ;;  %s4096_s27 = sphi %s4172_s27, %s5873_s27   ;;  %s4092_s26 = sphi %s4170_s26, %s5872_s26  }
   0x5   : > { %s33_s12 = sadd.s32 1, %s4108_s30  ;;  %s196_s13 = sadd.s32 1, %s4100_s28 }
   0x6   : > { %p35_p0 = scmp.ge.s32.totalorder %s33_s12, 2  ;;  %p206_p1 = scmp.ne.s32.totalorder %s4100_s28, %s4096_s27 }
   0x7   : > { %p207_p2 = scmp.eq.s32.totalorder %s3419_s10, 1  ;;  %p212_p3 = scmp.ne.s32.totalorder %s4096_s27, %s4092_s26 }
   0x8   : > { %s5878_s12 = smov (%p35_p0, %s33_s12), 0  ;;  %p213_p5 = scmp.eq.s32.totalorder %s3420_s11, 1 }
   0x9   : > { %p4210_p4 = por %p207_p2, %p206_p1  ;;  %s191_s15 = ssub.s32 %s4108_s30, %s5878_s12 }
   0xa   : > { %p3423_p6 = scmp.ge.s32.totalorder %s4112_s9, 1  ;;  %p194_p7 = scmp.eq.s32.totalorder %s191_s15, 0 }
   0xb   : > { %p4217_p8 = por %p213_p5, %p212_p3  ;;  %p263_p9 = scmp.lt.s32.totalorder %s4112_s9, 3 }
   0xc   : > { %s4223_s17 = scalar_select %p194_p7, %s4100_s28, %s196_s13  }
   0xd   : > { %p264_p10 = pnand %p3423_p6, %p263_p9 }
   0xe   : > { %p301_p11 = scmp.lt.s32.totalorder (!%p264_p10), %s4104_s29, 1  ;;  %s4115_s25 = smov (!%p264_p10), 24  }
   0xf   : > { %267 = sbr.rel (%p264_p10) target bundleno = 1260 (0x4ec), region = 48  ;;  %s4116_s1 = smov (!%p264_p10), 48  }
  0x10   : > { %s4117_s13 = smov (!%p264_p10), 32   ;;  %s4118_s15 = smov (!%p264_p10), 56  }
  0x11   : > { %s4119_s22 = smov (!%p264_p10), 8   ;;  %s4120_s23 = smov (!%p264_p10), 64  }
  0x12   : > { %s4121_s10 = smov (!%p264_p10), 16   ;;  %s4122_s18 = smov (!%p264_p10), 40  }
  0x14   : > { %v344_v0 = vld [vmem:[%s5863_s2] sm:$0xff]  ;;  %s302_s20 = scalar_select %p301_p11, %s4104_s29, 1  ;;  %vm352_vm0 = vcmask 64512   ;;  %v4114_v15 = vmov 0.0   ;;  %vm706_vm1 = vcmask 57344   ;;  %vm2126_vm2 = vcmask 130048  }
  0x15   : > { %3706 = vmatprep.subr.mxu0 %v344_v0  ;;  %776 = vst.msk [vmem:[#allocation2 + $0x1] sm:$0xff] %vm352_vm0, %v4114_v15  ;;  %777 = vst.msk [vmem:[#allocation2 + $0x9] sm:$0xff] %vm352_vm0, %v4114_v15  ;;  %v4333_v30 = vld [vmem:[%s5864_s3] ss:$0 sm:$0xff]  ;;  %vm2159_vm3 = vcmask 195584   ;;  %vm2192_vm4 = vcmask 261120  }
  0x16   : > { %3707 = vmatpush3.msra.mxu0 %v344_v0  ;;  %s3564_s21 = sshll.u32 %s302_s20, 8  ;;  %779 = vst.msk [vmem:[#allocation2 + $0x199] sm:$0xff] %vm352_vm0, %v4114_v15  ;;  %780 = vst.msk [vmem:[#allocation2 + $0x1a1] sm:$0xff] %vm352_vm0, %v4114_v15  ;;  %vm2225_vm5 = vcmask 326656   ;;  %vm2258_vm6 = vcmask 392192   ;;  %vm2291_vm7 = vcmask 457728  }
  0x17   : > { %s4233_s24 = scalar_lea.vmem %s5861_s0, %s3564_s21  ;;  %725 = vst.msk [vmem:[#allocation2 + $0x11] sm:$0x1] %vm706_vm1, %v4114_v15  ;;  %707 = vst.msk [vmem:[#allocation2] sm:$0x1] %vm706_vm1, %v4114_v15  ;;  %vm2324_vm8 = vcmask 523264   ;;  %vm2373_vm9 = vcmask 588800  }
  0x18   : > { %v4236_v1 = vld [vmem:[%s4233_s24] sm:$0xff]  ;;  %v313_v2 = vld [vmem:[%s4233_s24 + $0x8] sm:$0xff]  ;;  %v314_v3 = vld [vmem:[%s4233_s24 + $0x10] sm:$0xff]  ;;  %708 = vst.msk [vmem:[#allocation2 + $0x18] sm:$0x1] %vm706_vm1, %v4114_v15 }
  0x19   : > { %3708 = vmatprep.mubr.msk.f32.mxu0 %vm352_vm0, %v4236_v1  ;;  %v315_v4 = vld [vmem:[%s4233_s24 + $0x18] sm:$0xff]  ;;  %v316_v5 = vld [vmem:[%s4233_s24 + $0x20] sm:$0xff]  ;;  %v317_v6 = vld [vmem:[%s4233_s24 + $0x28] sm:$0xff]  ;;  %709 = vst.msk [vmem:[#allocation2 + $0x30] sm:$0x1] %vm706_vm1, %v4114_v15 }
  0x1a   : > { %3709 = vmatmul.mubr.msk.f32.vlgmr.msra.gmra.mxu0 %vm352_vm0, %v313_v2  ;;  %v318_v7 = vld [vmem:[%s4233_s24 + $0x30] sm:$0xff]  ;;  %v319_v8 = vld [vmem:[%s4233_s24 + $0x38] sm:$0xff]  ;;  %v320_v9 = vld [vmem:[%s4233_s24 + $0x40] sm:$0xff]  ;;  %710 = vst.msk [vmem:[#allocation2 + $0x48] sm:$0x1] %vm706_vm1, %v4114_v15 }
  0x1b   : > { %3711 = vmatprep.mubr.msk.f32.mxu0 %vm352_vm0, %v314_v3  ;;  %v321_v10 = vld [vmem:[%s4233_s24 + $0x48] sm:$0xff]  ;;  %v322_v11 = vld [vmem:[%s4233_s24 + $0x50] sm:$0xff]  ;;  %v323_v12 = vld [vmem:[%s4233_s24 + $0x58] sm:$0xff]  ;;  %711 = vst.msk [vmem:[#allocation2 + $0x60] sm:$0x1] %vm706_vm1, %v4114_v15 }
  0x1c   : > { %v324_v13 = vld [vmem:[%s4233_s24 + $0x60] sm:$0xff]  ;;  %v325_v14 = vld [vmem:[%s4233_s24 + $0x68] sm:$0xff]  ;;  %712 = vst.msk [vmem:[#allocation2 + $0x78] sm:$0x1] %vm706_vm1, %v4114_v15  ;;  %713 = vst.msk [vmem:[#allocation2 + $0x90] sm:$0x1] %vm706_vm1, %v4114_v15 }
  0x1d   : > { %714 = vst.msk [vmem:[#allocation2 + $0xa8] sm:$0x1] %vm706_vm1, %v4114_v15  ;;  %715 = vst.msk [vmem:[#allocation2 + $0xc0] sm:$0x1] %vm706_vm1, %v4114_v15  ;;  %v878_v16 = vld [vmem:[#allocation2 + $0x1] sm:$0xff]  ;;  %v879_v17 = vld [vmem:[#allocation2 + $0x9] sm:$0xff] }
  0x1e   : > { %3712 = vmatmul.mubr.msk.f32.gmra.mxu0 %vm352_vm0, %v315_v4  ;;  %716 = vst.msk [vmem:[#allocation2 + $0xd8] sm:$0x1] %vm706_vm1, %v4114_v15  ;;  %717 = vst.msk [vmem:[#allocation2 + $0xf0] sm:$0x1] %vm706_vm1, %v4114_v15  ;;  %1358 = vrot.lane.b32.xlu0 %v878_v16, %s4115_s25  ;;  %v326_v18 = vld [vmem:[%s4233_s24 + $0x70] sm:$0xff]  ;;  %v327_v19 = vld [vmem:[%s4233_s24 + $0x78] sm:$0xff] }
  0x1f   : > { %3714 = vmatprep.mubr.msk.f32.mxu0 %vm352_vm0, %v316_v5  ;;  %718 = vst.msk [vmem:[#allocation2 + $0x108] sm:$0x1] %vm706_vm1, %v4114_v15  ;;  %719 = vst.msk [vmem:[#allocation2 + $0x120] sm:$0x1] %vm706_vm1, %v4114_v15  ;;  %1360 = vrot.lane.b32.xlu1 %v879_v17, %s4115_s25  ;;  %v975_v20 = vld [vmem:[#allocation2 + $0xa] sm:$0xff]  ;;  %v974_v21 = vld [vmem:[#allocation2 + $0x2] sm:$0xff] }
  0x20   : > { %720 = vst.msk [vmem:[#allocation2 + $0x138] sm:$0x1] %vm706_vm1, %v4114_v15  ;;  %721 = vst.msk [vmem:[#allocation2 + $0x150] sm:$0x1] %vm706_vm1, %v4114_v15  ;;  %v328_v22 = vld [vmem:[%s4233_s24 + $0x80] sm:$0xff]  ;;  %v329_v23 = vld [vmem:[%s4233_s24 + $0x88] sm:$0xff] }
  0x21   : > { %722 = vst.msk [vmem:[#allocation2 + $0x168] sm:$0x1] %vm706_vm1, %v4114_v15  ;;  %723 = vst.msk [vmem:[#allocation2 + $0x180] sm:$0x1] %vm706_vm1, %v4114_v15  ;;  %v330_v24 = vld [vmem:[%s4233_s24 + $0x90] sm:$0xff]  ;;  %v331_v25 = vld [vmem:[%s4233_s24 + $0x98] sm:$0xff] }
  0x22   : > { %3715 = vmatmul.mubr.msk.f32.gmra.mxu0 %vm352_vm0, %v317_v6  ;;  %724 = vst.msk [vmem:[#allocation2 + $0x198] sm:$0x1] %vm706_vm1, %v4114_v15  ;;  %726 = vst.msk [vmem:[#allocation2 + $0x29] sm:$0x1] %vm706_vm1, %v4114_v15  ;;  %1744 = vrot.lane.b32.xlu0 %v975_v20, %s4116_s1  ;;  %v332_v26 = vld [vmem:[%s4233_s24 + $0xa0] sm:$0xff]  ;;  %v333_v27 = vld [vmem:[%s4233_s24 + $0xa8] sm:$0xff] }
  0x23   : > { %3717 = vmatprep.mubr.msk.f32.mxu0 %vm352_vm0, %v318_v7  ;;  %727 = vst.msk [vmem:[#allocation2 + $0x41] sm:$0x1] %vm706_vm1, %v4114_v15  ;;  %728 = vst.msk [vmem:[#allocation2 + $0x59] sm:$0x1] %vm706_vm1, %v4114_v15  ;;  %1742 = vrot.lane.b32.xlu1 %v974_v21, %s4116_s1  ;;  %v334_v28 = vld [vmem:[%s4233_s24 + $0xb0] sm:$0xff]  ;;  %v335_v29 = vld [vmem:[%s4233_s24 + $0xb8] sm:$0xff] }
  0x24   : > { %729 = vst.msk [vmem:[#allocation2 + $0x71] sm:$0x1] %vm706_vm1, %v4114_v15  ;;  %730 = vst.msk [vmem:[#allocation2 + $0x89] sm:$0x1] %vm706_vm1, %v4114_v15  ;;  %v336_v42 = vld [vmem:[%s4233_s24 + $0xc0] sm:$0xff]  ;;  %v337_v46 = vld [vmem:[%s4233_s24 + $0xc8] sm:$0xff] }
  0x25   : > { %731 = vst.msk [vmem:[#allocation2 + $0xa1] sm:$0x1] %vm706_vm1, %v4114_v15  ;;  %732 = vst.msk [vmem:[#allocation2 + $0xb9] sm:$0x1] %vm706_vm1, %v4114_v15  ;;  %v338_v16 = vld [vmem:[%s4233_s24 + $0xd0] sm:$0xff]  ;;  %v2361_v21 = vld [vmem:[%s5865_s4 + $0x20] sm:$0xff] }
  0x26   : > { %3718 = vmatmul.mubr.msk.f32.gmra.mxu0 %vm352_vm0, %v319_v8  ;;  %733 = vst.msk [vmem:[#allocation2 + $0xd1] sm:$0x1] %vm706_vm1, %v4114_v15  ;;  %734 = vst.msk [vmem:[#allocation2 + $0xe9] sm:$0x1] %vm706_vm1, %v4114_v15 }
  0x27   : > { %3720 = vmatprep.mubr.msk.f32.mxu0 %vm352_vm0, %v320_v9  ;;  %735 = vst.msk [vmem:[#allocation2 + $0x101] sm:$0x1] %vm706_vm1, %v4114_v15  ;;  %736 = vst.msk [vmem:[#allocation2 + $0x119] sm:$0x1] %vm706_vm1, %v4114_v15 }
  0x28   : > { %737 = vst.msk [vmem:[#allocation2 + $0x131] sm:$0x1] %vm706_vm1, %v4114_v15  ;;  %738 = vst.msk [vmem:[#allocation2 + $0x149] sm:$0x1] %vm706_vm1, %v4114_v15 }
  0x29   : > { %739 = vst.msk [vmem:[#allocation2 + $0x161] sm:$0x1] %vm706_vm1, %v4114_v15  ;;  %740 = vst.msk [vmem:[#allocation2 + $0x179] sm:$0x1] %vm706_vm1, %v4114_v15 }
  0x2a   : > { %3721 = vmatmul.mubr.msk.f32.gmra.mxu0 %vm352_vm0, %v321_v10  ;;  %741 = vst.msk [vmem:[#allocation2 + $0x191] sm:$0x1] %vm706_vm1, %v4114_v15  ;;  %742 = vst.msk [vmem:[#allocation2 + $0x1a9] sm:$0x1] %vm706_vm1, %v4114_v15  ;;  %v2363_v15 = vld [vmem:[%s5865_s4 + $0x30] sm:$0xff] }
  0x2b   : > { %3723 = vmatprep.mubr.msk.f32.mxu0 %vm352_vm0, %v322_v11  ;;  %v2365_v11 = vld [vmem:[%s5865_s4 + $0x40] sm:$0xff] }
  0x2c   : > { %3756 = vmatprep.subr.mxu0 %v2365_v11  ;;  %3922 = vmatprep.subr.mxu1 %v2365_v11 }
  0x2d   : > { %3757 = vmatpush3.msra.mxu0 %v2365_v11  ;;  %3931 = vmatpush3.msra.mxu1 %v2365_v11 }
  0x2e   : > { %3724 = vmatmul.mubr.msk.f32.gmra.mxu0 %vm352_vm0, %v323_v12 }
  0x2f   : > { %3726 = vmatprep.mubr.msk.f32.mxu0 %vm352_vm0, %v324_v13  ;;  %v2364_v13 = vld [vmem:[%s5865_s4 + $0x38] sm:$0xff] }
  0x30   : > { %3758 = vmatprep.subr.mxu0 %v2364_v13  ;;  %3923 = vmatprep.subr.mxu1 %v2364_v13 }
  0x31   : > { %3759 = vmatpush3.msra.mxu0 %v2364_v13  ;;  %3932 = vmatpush3.msra.mxu1 %v2364_v13 }
  0x32   : > { %3727 = vmatmul.mubr.msk.f32.gmra.mxu0 %vm352_vm0, %v325_v14  ;;  %3760 = vmatprep.subr.mxu0 %v2363_v15 }
  0x33   : > { %3729 = vmatprep.mubr.msk.f32.mxu0 %vm352_vm0, %v326_v18  ;;  %v339_v18 = vld [vmem:[%s4233_s24 + $0xd8] sm:$0xff]  ;;  %3761 = vmatpush3.msra.mxu0 %v2363_v15 }
  0x34   : > { %3924 = vmatprep.subr.mxu1 %v2363_v15 }
  0x35   : > { %3933 = vmatpush3.msra.mxu1 %v2363_v15 }
  0x36   : > { %3730 = vmatmul.mubr.msk.f32.gmra.mxu0 %vm352_vm0, %v327_v19  ;;  %v2362_v19 = vld [vmem:[%s5865_s4 + $0x28] sm:$0xff] }
  0x37   : > { %3732 = vmatprep.mubr.msk.f32.mxu0 %vm352_vm0, %v328_v22  ;;  %3762 = vmatprep.subr.mxu0 %v2362_v19  ;;  %v340_v22 = vld [vmem:[%s4233_s24 + $0xe0] sm:$0xff] }
  0x38   : > { %3763 = vmatpush3.msra.mxu0 %v2362_v19  ;;  %3925 = vmatprep.subr.mxu1 %v2362_v19 }
  0x39   : > { %3764 = vmatprep.subr.mxu0 %v2361_v21  ;;  %3934 = vmatpush3.msra.mxu1 %v2362_v19 }
  0x3a   : > { %3733 = vmatmul.mubr.msk.f32.gmra.mxu0 %vm352_vm0, %v329_v23  ;;  %v341_v23 = vld [vmem:[%s4233_s24 + $0xe8] sm:$0xff]  ;;  %3926 = vmatprep.subr.mxu1 %v2361_v21 }
  0x3b   : > { %3735 = vmatprep.mubr.msk.f32.mxu0 %vm352_vm0, %v330_v24  ;;  %v2360_v24 = vld [vmem:[%s5865_s4 + $0x18] sm:$0xff]  ;;  %3765 = vmatpush3.msra.mxu0 %v2361_v21 }
  0x3c   : > { %3766 = vmatprep.subr.mxu0 %v2360_v24  ;;  %3935 = vmatpush3.msra.mxu1 %v2361_v21 }
  0x3d   : > { %3767 = vmatpush3.msra.mxu0 %v2360_v24  ;;  %3927 = vmatprep.subr.mxu1 %v2360_v24 }
  0x3e   : > { %3736 = vmatmul.mubr.msk.f32.gmra.mxu0 %vm352_vm0, %v331_v25  ;;  %v2359_v25 = vld [vmem:[%s5865_s4 + $0x10] sm:$0xff]  ;;  %3936 = vmatpush3.msra.mxu1 %v2360_v24 }
  0x3f   : > { %3738 = vmatprep.mubr.msk.f32.mxu0 %vm352_vm0, %v332_v26  ;;  %v342_v26 = vld [vmem:[%s4233_s24 + $0xf0] sm:$0xff]  ;;  %3768 = vmatprep.subr.mxu0 %v2359_v25 }
  0x40   : > { %3769 = vmatpush3.msra.mxu0 %v2359_v25  ;;  %3928 = vmatprep.subr.mxu1 %v2359_v25 }
  0x41   : > { %3937 = vmatpush3.msra.mxu1 %v2359_v25 }
  0x42   : > { %3739 = vmatmul.mubr.msk.f32.gmra.mxu0 %vm352_vm0, %v333_v27 }
  0x43   : > { %3741 = vmatprep.mubr.msk.f32.mxu0 %vm352_vm0, %v334_v28  ;;  %v343_v28 = vld [vmem:[%s4233_s24 + $0xf8] sm:$0xff] }
  0x46   : > { %3742 = vmatmul.mubr.msk.f32.gmra.mxu0 %vm352_vm0, %v335_v29  ;;  %v2358_v29 = vld [vmem:[%s5865_s4 + $0x8] sm:$0xff] }
  0x47   : > { %3744 = vmatprep.mubr.msk.f32.mxu0 %vm352_vm0, %v336_v42  ;;  %3770 = vmatprep.subr.mxu0 %v2358_v29 }
  0x48   : > { %3771 = vmatpush3.msra.mxu0 %v2358_v29  ;;  %3929 = vmatprep.subr.mxu1 %v2358_v29 }
  0x49   : > { %3938 = vmatpush3.msra.mxu1 %v2358_v29 }
  0x4a   : > { %3745 = vmatmul.mubr.msk.f32.gmra.mxu0 %vm352_vm0, %v337_v46 }
  0x4b   : > { %3747 = vmatprep.mubr.msk.f32.mxu0 %vm352_vm0, %v338_v16 }
  0x4e   : > { %3748 = vmatmul.mubr.msk.f32.gmra.mxu0 %vm352_vm0, %v339_v18 }
  0x4f   : > { %3750 = vmatprep.mubr.msk.f32.mxu0 %vm352_vm0, %v340_v22 }
  0x52   : > { %3751 = vmatmul.mubr.msk.f32.gmra.mxu0 %vm352_vm0, %v341_v23 }
  0x53   : > { %3753 = vmatprep.mubr.msk.f32.mxu0 %vm352_vm0, %v342_v26 }
  0x56   : > { %3754 = vmatmul.mubr.msk.f32.gmra.mxu0 %vm352_vm0, %v343_v28 }
  0xda   : > { %v3710_v31 = vpop.f32.mrf.mxu0 }
  0xdb   : > { %v521_v32 = vadd.f32 %v3710_v31, %v4333_v30  ;;  %v2357_v31 = vld [vmem:[%s5865_s4] sm:$0xff] }
  0xdc   : > { %v515_v33 = vpop.f32.mrf.mxu0  ;;  %3772 = vmatprep.subr.mxu0 %v2357_v31  ;;  %3930 = vmatprep.subr.mxu1 %v2357_v31 }
  0xdd   : > { %v675_v34 = vmax.f32 %v521_v32, 0.0  ;;  %v516_v35 = vadd.f32 %v4333_v30, %v515_v33  ;;  %3773 = vmatpush3.msra.mxu0 %v2357_v31  ;;  %3939 = vmatpush3.msra.mxu1 %v2357_v31 }
  0xde   : > { %v3713_v36 = vpop.f32.mrf.mxu0 }
  0xdf   : > { %745 = vst.msk [vmem:[#allocation2 + $0x21] sm:$0xff] %vm352_vm0, %v675_v34  ;;  %v674_v37 = vmax.f32 %v516_v35, 0.0  ;;  %v531_v38 = vadd.f32 %v3713_v36, %v4333_v30 }
  0xe0   : > { %v525_v39 = vpop.f32.mrf.mxu0 }
  0xe1   : > { %744 = vst.msk [vmem:[#allocation2 + $0x19] sm:$0xff] %vm352_vm0, %v674_v37  ;;  %v677_v40 = vmax.f32 %v531_v38, 0.0  ;;  %v526_v41 = vadd.f32 %v4333_v30, %v525_v39 }
  0xe2   : > { %v3716_v43 = vpop.f32.mrf.mxu0 }
  0xe3   : > { %747 = vst.msk [vmem:[#allocation2 + $0x39] sm:$0xff] %vm352_vm0, %v677_v40  ;;  %v676_v44 = vmax.f32 %v526_v41, 0.0  ;;  %v541_v45 = vadd.f32 %v3716_v43, %v4333_v30 }
  0xe4   : > { %v535_v47 = vpop.f32.mrf.mxu0 }
  0xe5   : > { %746 = vst.msk [vmem:[#allocation2 + $0x31] sm:$0xff] %vm352_vm0, %v676_v44  ;;  %v679_v48 = vmax.f32 %v541_v45, 0.0  ;;  %v536_v49 = vadd.f32 %v4333_v30, %v535_v47 }
  0xe6   : > { %v911_v50 = vld [vmem:[#allocation2 + $0x21] sm:$0xff]  ;;  %v3719_v51 = vpop.f32.mrf.mxu0 }
  0xe7   : > { %1488 = vrot.lane.b32.xlu0 %v911_v50, %s4117_s13  ;;  %749 = vst.msk [vmem:[#allocation2 + $0x51] sm:$0xff] %vm352_vm0, %v679_v48  ;;  %v678_v52 = vmax.f32 %v536_v49, 0.0  ;;  %v551_v53 = vadd.f32 %v3719_v51, %v4333_v30  ;;  %v1007_v2 = vld [vmem:[#allocation2 + $0x22] sm:$0xff] }
  0xe8   : > { %v4352_v54 = vld [vmem:[#allocation2 + $0x19] sm:$0xff]  ;;  %v545_v55 = vpop.f32.mrf.mxu0 }
  0xe9   : > { %1362 = vrot.lane.b32.xlu1 %v4352_v54, %s4115_s25  ;;  %748 = vst.msk [vmem:[#allocation2 + $0x49] sm:$0xff] %vm352_vm0, %v678_v52  ;;  %v681_v56 = vmax.f32 %v551_v53, 0.0  ;;  %v546_v57 = vadd.f32 %v4333_v30, %v545_v55  ;;  %v1006_v61 = vld [vmem:[#allocation2 + $0x1a] sm:$0xff] }
  0xea   : > { %v3722_v58 = vpop.f32.mrf.mxu0  ;;  %v4370_v9 = vld [vmem:[#allocation2 + $0x39] sm:$0xff] }
  0xeb   : > { %1364 = vrot.lane.b32.xlu0 %v911_v50, %s4115_s25  ;;  %751 = vst.msk [vmem:[#allocation2 + $0x69] sm:$0xff] %vm352_vm0, %v681_v56  ;;  %v680_v59 = vmax.f32 %v546_v57, 0.0  ;;  %v561_v60 = vadd.f32 %v3722_v58, %v4333_v30  ;;  %v4380_v12 = vld [vmem:[#allocation2 + $0x18] sm:$0xff]  ;;  %v4395_v17 = vld [vmem:[#allocation2 + $0x20] sm:$0xff] }
  0xec   : > { %v555_v62 = vpop.f32.mrf.mxu0  ;;  %v4387_v14 = vld [vmem:[#allocation2 + $0x3a] sm:$0xff]  ;;  %v4404_v20 = vld [vmem:[#allocation2 + $0x30] sm:$0xff] }
  0xed   : > { %1870 = vrot.lane.b32.xlu1 %v1006_v61, %s4118_s15  ;;  %750 = vst.msk [vmem:[#allocation2 + $0x61] sm:$0xff] %vm352_vm0, %v680_v59  ;;  %v683_v63 = vmax.f32 %v561_v60, 0.0  ;;  %v556_v0 = vadd.f32 %v4333_v30, %v555_v62  ;;  %v4424_v27 = vld [vmem:[#allocation2 + $0x38] sm:$0xff] }
  0xee   : > { %v3725_v3 = vpop.f32.mrf.mxu0  ;;  %v942_v33 = vld [vmem:[#allocation2 + $0x31] sm:$0xff] }
  0xef   : > { %1872 = vrot.lane.b32.xlu0 %v1007_v2, %s4118_s15  ;;  %753 = vst.msk [vmem:[#allocation2 + $0x81] sm:$0xff] %vm352_vm0, %v683_v63  ;;  %v682_v4 = vmax.f32 %v556_v0, 0.0  ;;  %v571_v5 = vadd.f32 %v3725_v3, %v4333_v30  ;;  %v1038_v39 = vld [vmem:[#allocation2 + $0x32] sm:$0xff] }
  0xf0   : > { %v565_v6 = vpop.f32.mrf.mxu0  ;;  %v945_v40 = vld [vmem:[#allocation2 + $0x51] sm:$0xff]  ;;  %v4471_v46 = vld [vmem:[#allocation2 + $0x48] sm:$0xff] }
  0xf1   : > { %1746 = vrot.lane.b32.xlu1 %v1006_v61, %s4116_s1  ;;  %752 = vst.msk [vmem:[#allocation2 + $0x79] sm:$0xff] %vm352_vm0, %v682_v4  ;;  %v685_v7 = vmax.f32 %v571_v5, 0.0  ;;  %v566_v8 = vadd.f32 %v4333_v30, %v565_v6  ;;  %v1011_v41 = vld [vmem:[#allocation2 + $0x52] sm:$0xff]  ;;  %v914_v50 = vld [vmem:[#allocation2 + $0x49] sm:$0xff]  ;;  %v4511_v5 = vpop.permute.xlu0 %1358 }
  0xf2   : > { %v3728_v32 = vpop.f32.mrf.mxu0  ;;  %v4466_v43 = vld [vmem:[#allocation2 + $0x50] sm:$0xff] }
  0xf3   : > { %1748 = vrot.lane.b32.xlu0 %v1007_v2, %s4116_s1  ;;  %755 = vst.msk [vmem:[#allocation2 + $0x99] sm:$0xff] %vm352_vm0, %v685_v7  ;;  %v684_v10 = vmax.f32 %v566_v8, 0.0  ;;  %v581_v34 = vadd.f32 %v3728_v32, %v4333_v30  ;;  %v1040_v51 = vld [vmem:[#allocation2 + $0x4a] sm:$0xff]  ;;  %v4515_v7 = vpop.permute.xlu1 %1360 }
  0xf4   : > { %v575_v35 = vpop.f32.mrf.mxu0  ;;  %v947_v52 = vld [vmem:[#allocation2 + $0x69] sm:$0xff]  ;;  %v4502_v61 = vld [vmem:[#allocation2 + $0x60] sm:$0xff] }
  0xf5   : > { %1492 = vrot.lane.b32.xlu1 %v4370_v9, %s4117_s13  ;;  %754 = vst.msk [vmem:[#allocation2 + $0x91] sm:$0xff] %vm352_vm0, %v684_v10  ;;  %v687_v36 = vmax.f32 %v581_v34, 0.0  ;;  %v576_v37 = vadd.f32 %v4333_v30, %v575_v35  ;;  %v1013_v59 = vld [vmem:[#allocation2 + $0x6a] sm:$0xff]  ;;  %v916_v4 = vld [vmem:[#allocation2 + $0x61] sm:$0xff] }
  0xf6   : > { %v3731_v42 = vpop.f32.mrf.mxu0  ;;  %v4498_v60 = vld [vmem:[#allocation2 + $0x68] sm:$0xff] }
  0xf7   : > { %1102 = vrot.lane.b32.xlu0 %v4380_v12, %s4119_s22  ;;  %757 = vst.msk [vmem:[#allocation2 + $0xb1] sm:$0xff] %vm352_vm0, %v687_v36  ;;  %v686_v38 = vmax.f32 %v576_v37, 0.0  ;;  %v591_v44 = vadd.f32 %v3731_v42, %v4333_v30  ;;  %v1042_v8 = vld [vmem:[#allocation2 + $0x62] sm:$0xff]  ;;  %v4524_v11 = vpop.permute.xlu1 %1742 }
  0xf8   : > { %v585_v45 = vpop.f32.mrf.mxu0  ;;  %v949_v10 = vld [vmem:[#allocation2 + $0x81] sm:$0xff]  ;;  %v4553_v29 = vld [vmem:[#allocation2 + $0x78] sm:$0xff] }
  0xf9   : > { %2000 = vrot.lane.b32.xlu1 %v4387_v14, %s4120_s23  ;;  %756 = vst.msk [vmem:[#allocation2 + $0xa9] sm:$0xff] %vm352_vm0, %v686_v38  ;;  %v689_v47 = vmax.f32 %v591_v44, 0.0  ;;  %v586_v48 = vadd.f32 %v4333_v30, %v585_v45  ;;  %v1015_v16 = vld [vmem:[#allocation2 + $0x82] sm:$0xff]  ;;  %v918_v36 = vld [vmem:[#allocation2 + $0x79] sm:$0xff] }
  0xfa   : > { %v3734_v53 = vpop.f32.mrf.mxu0  ;;  %v4546_v24 = vld [vmem:[#allocation2 + $0x80] sm:$0xff] }
  0xfb   : > { %1104 = vrot.lane.b32.xlu0 %v4395_v17, %s4119_s22  ;;  %759 = vst.msk [vmem:[#allocation2 + $0xc9] sm:$0xff] %vm352_vm0, %v689_v47  ;;  %v688_v49 = vmax.f32 %v586_v48, 0.0  ;;  %v781_v42 = vld [vmem:[#allocation2] sm:$0xff] }
  0xfc   : > { %v595_v55 = vpop.f32.mrf.mxu0  ;;  %v951_v48 = vld [vmem:[#allocation2 + $0x99] sm:$0xff] }
  0xfd   : > { %1230 = vrot.lane.b32.xlu1 %v4404_v20, %s4121_s10  ;;  %758 = vst.msk [vmem:[#allocation2 + $0xc1] sm:$0xff] %vm352_vm0, %v688_v49  ;;  %v596_v57 = vadd.f32 %v4333_v30, %v595_v55 }
  0xfe   : > { %v3737_v62 = vpop.f32.mrf.mxu0 }
  0xff   : > { %1486 = vrot.lane.b32.xlu0 %v4352_v54, %s4117_s13  ;;  %v601_v54 = vadd.f32 %v3734_v53, %v4333_v30  ;;  %v690_v58 = vmax.f32 %v596_v57, 0.0  ;;  %v611_v63 = vadd.f32 %v3737_v62, %v4333_v30 }
 0x100   : > { %v605_v0 = vpop.f32.mrf.mxu0 }
 0x101   : > { %1232 = vrot.lane.b32.xlu1 %v4424_v27, %s4121_s10  ;;  %v691_v56 = vmax.f32 %v601_v54, 0.0  ;;  %760 = vst.msk [vmem:[#allocation2 + $0xd9] sm:$0xff] %vm352_vm0, %v690_v58  ;;  %v693_v2 = vmax.f32 %v611_v63, 0.0  ;;  %v606_v3 = vadd.f32 %v4333_v30, %v605_v0  ;;  %v1017_v0 = vld [vmem:[#allocation2 + $0x9a] sm:$0xff] }
 0x102   : > { %v3740_v23 = vpop.f32.mrf.mxu0 }
 0x103   : > { %1616 = vrot.lane.b32.xlu0 %v4370_v9, %s4122_s18  ;;  %761 = vst.msk [vmem:[#allocation2 + $0xe1] sm:$0xff] %vm352_vm0, %v691_v56  ;;  %763 = vst.msk [vmem:[#allocation2 + $0xf9] sm:$0xff] %vm352_vm0, %v693_v2  ;;  %v692_v6 = vmax.f32 %v606_v3, 0.0  ;;  %v621_v25 = vadd.f32 %v3740_v23, %v4333_v30 }
 0x104   : > { %v615_v28 = vpop.f32.mrf.mxu0 }
 0x105   : > { %1106 = vrot.lane.b32.xlu1 %v4404_v20, %s4119_s22  ;;  %762 = vst.msk [vmem:[#allocation2 + $0xf1] sm:$0xff] %vm352_vm0, %v692_v6  ;;  %v695_v31 = vmax.f32 %v621_v25, 0.0  ;;  %v616_v32 = vadd.f32 %v4333_v30, %v615_v28  ;;  %v4617_v25 = vld [vmem:[#allocation2 + $0x90] sm:$0xff] }
 0x107   : > { %1368 = vrot.lane.b32.xlu0 %v4370_v9, %s4115_s25  ;;  %v4521_v9 = vpop.permute.xlu0 %1744  ;;  %765 = vst.msk [vmem:[#allocation2 + $0x111] sm:$0xff] %vm352_vm0, %v695_v31  ;;  %v694_v34 = vmax.f32 %v616_v32, 0.0 }
 0x109   : > { %1614 = vrot.lane.b32.xlu1 %v942_v33, %s4122_s18  ;;  %764 = vst.msk [vmem:[#allocation2 + $0x109] sm:$0xff] %vm352_vm0, %v694_v34 }
 0x10b   : > { %1876 = vrot.lane.b32.xlu0 %v4387_v14, %s4118_s15 }
 0x10d   : > { %1490 = vrot.lane.b32.xlu1 %v942_v33, %s4117_s13 }
 0x10f   : > { %1752 = vrot.lane.b32.xlu0 %v4387_v14, %s4116_s1 }
 0x111   : > { %1998 = vrot.lane.b32.xlu1 %v1038_v39, %s4120_s23 }
 0x113   : > { %1108 = vrot.lane.b32.xlu0 %v4424_v27, %s4119_s22 }
 0x115   : > { %1366 = vrot.lane.b32.xlu1 %v942_v33, %s4115_s25 }
 0x117   : > { %1620 = vrot.lane.b32.xlu0 %v945_v40, %s4122_s18 }
 0x119   : > { %1874 = vrot.lane.b32.xlu1 %v1038_v39, %s4118_s15 }
 0x11b   : > { %1372 = vrot.lane.b32.xlu0 %v945_v40, %s4115_s25 }
 0x11d   : > { %1750 = vrot.lane.b32.xlu1 %v1038_v39, %s4116_s1  ;;  %v782_v39 = vld [vmem:[#allocation2 + $0x8] sm:$0xff] }
 0x11f   : > { %1880 = vrot.lane.b32.xlu0 %v1011_v41, %s4118_s15 }
 0x121   : > { %1496 = vrot.lane.b32.xlu1 %v945_v40, %s4117_s13  ;;  %v1044_v40 = vld [vmem:[#allocation2 + $0x7a] sm:$0xff] }
 0x123   : > { %1756 = vrot.lane.b32.xlu0 %v1011_v41, %s4116_s1 }
 0x125   : > { %2004 = vrot.lane.b32.xlu1 %v1011_v41, %s4120_s23 }
 0x127   : > { %1236 = vrot.lane.b32.xlu0 %v4466_v43, %s4121_s10 }
 0x129   : > { %1234 = vrot.lane.b32.xlu1 %v4471_v46, %s4121_s10 }
 0x12b   : > { %1110 = vrot.lane.b32.xlu0 %v4471_v46, %s4119_s22 }
 0x12d   : > { %1494 = vrot.lane.b32.xlu1 %v914_v50, %s4117_s13 }
 0x12f   : > { %1618 = vrot.lane.b32.xlu0 %v914_v50, %s4122_s18 }
 0x131   : > { %2002 = vrot.lane.b32.xlu1 %v1040_v51, %s4120_s23 }
 0x133   : > { %1112 = vrot.lane.b32.xlu0 %v4466_v43, %s4119_s22 }
 0x135   : > { %1370 = vrot.lane.b32.xlu1 %v914_v50, %s4115_s25 }
 0x137   : > { %1624 = vrot.lane.b32.xlu0 %v947_v52, %s4122_s18 }
 0x139   : > { %1878 = vrot.lane.b32.xlu1 %v1040_v51, %s4118_s15 }
 0x13b   : > { %1376 = vrot.lane.b32.xlu0 %v947_v52, %s4115_s25 }
 0x13d   : > { %1754 = vrot.lane.b32.xlu1 %v1040_v51, %s4116_s1 }
 0x13f   : > { %1884 = vrot.lane.b32.xlu0 %v1013_v59, %s4118_s15 }
 0x141   : > { %1500 = vrot.lane.b32.xlu1 %v947_v52, %s4117_s13 }
 0x143   : > { %1760 = vrot.lane.b32.xlu0 %v1013_v59, %s4116_s1 }
 0x145   : > { %2008 = vrot.lane.b32.xlu1 %v1013_v59, %s4120_s23 }
 0x147   : > { %1240 = vrot.lane.b32.xlu0 %v4498_v60, %s4121_s10 }
 0x149   : > { %1238 = vrot.lane.b32.xlu1 %v4502_v61, %s4121_s10 }
 0x14b   : > { %1114 = vrot.lane.b32.xlu0 %v4502_v61, %s4119_s22 }
 0x14d   : > { %1498 = vrot.lane.b32.xlu1 %v916_v4, %s4117_s13 }
 0x14f   : > { %1622 = vrot.lane.b32.xlu0 %v916_v4, %s4122_s18 }
 0x151   : > { %2006 = vrot.lane.b32.xlu1 %v1042_v8, %s4120_s23 }
 0x153   : > { %1116 = vrot.lane.b32.xlu0 %v4498_v60, %s4119_s22 }
 0x155   : > { %1374 = vrot.lane.b32.xlu1 %v916_v4, %s4115_s25 }
 0x157   : > { %1628 = vrot.lane.b32.xlu0 %v949_v10, %s4122_s18 }
 0x159   : > { %v1489_v13 = vpop.permute.xlu0 %1488  ;;  %1882 = vrot.lane.b32.xlu1 %v1042_v8, %s4118_s15 }
 0x15b   : > { %v4528_v14 = vpop.permute.xlu1 %1362  ;;  %1380 = vrot.lane.b32.xlu0 %v949_v10, %s4115_s25 }
 0x15d   : > { %v4531_v15 = vpop.permute.xlu0 %1364  ;;  %1758 = vrot.lane.b32.xlu1 %v1042_v8, %s4116_s1 }
 0x15f   : > { %v4534_v18 = vpop.permute.xlu1 %1870  ;;  %1888 = vrot.lane.b32.xlu0 %v1015_v16, %s4118_s15 }
 0x161   : > { %v4537_v19 = vpop.permute.xlu0 %1872  ;;  %1504 = vrot.lane.b32.xlu1 %v949_v10, %s4117_s13 }
 0x163   : > { %v4540_v21 = vpop.permute.xlu1 %1746  ;;  %1764 = vrot.lane.b32.xlu0 %v1015_v16, %s4116_s1 }
 0x165   : > { %v4543_v22 = vpop.permute.xlu0 %1748  ;;  %2012 = vrot.lane.b32.xlu1 %v1015_v16, %s4120_s23  ;;  %v4610_v16 = vld [vmem:[#allocation2 + $0x98] sm:$0xff] }
 0x167   : > { %v4549_v26 = vpop.permute.xlu1 %1492  ;;  %1244 = vrot.lane.b32.xlu0 %v4546_v24, %s4121_s10 }
 0x169   : > { %1242 = vrot.lane.b32.xlu1 %v4553_v29, %s4121_s10  ;;  %v1103_v33 = vpop.permute.xlu0 %1102 }
 0x16a   : > { %v2094_v49 = vsel %vm352_vm0, %v781_v42, %v1103_v33 }
 0x16b   : > { %v2001_v35 = vpop.permute.xlu1 %2000  ;;  %1118 = vrot.lane.b32.xlu0 %v4553_v29, %s4119_s22 }
 0x16d   : > { %1502 = vrot.lane.b32.xlu1 %v918_v36, %s4117_s13  ;;  %v1105_v37 = vpop.permute.xlu0 %1104 }
 0x16e   : > { %v2095_v44 = vsel %vm352_vm0, %v782_v39, %v1105_v37 }
 0x16f   : > { %v1231_v38 = vpop.permute.xlu1 %1230  ;;  %1626 = vrot.lane.b32.xlu0 %v918_v36, %s4122_s18 }
 0x170   : > { %v2127_v51 = vsel %vm2126_vm2, %v2094_v49, %v1231_v38  ;;  %v1046_v38 = vld [vmem:[#allocation2 + $0x92] sm:$0xff] }
 0x171   : > { %2010 = vrot.lane.b32.xlu1 %v1044_v40, %s4120_s23  ;;  %v1487_v41 = vpop.permute.xlu0 %1486  ;;  %v2160_v54 = vsel %vm2159_vm3, %v2127_v51, %v4511_v5 }
 0x172   : > { %v2193_v58 = vsel %vm2192_vm4, %v2160_v54, %v1487_v41  ;;  %v953_v41 = vld [vmem:[#allocation2 + $0xb1] sm:$0xff] }
 0x173   : > { %v1233_v45 = vpop.permute.xlu1 %1232  ;;  %1120 = vrot.lane.b32.xlu0 %v4546_v24, %s4119_s22 }
 0x174   : > { %v2128_v47 = vsel %vm2126_vm2, %v2095_v44, %v1233_v45 }
 0x175   : > { %1378 = vrot.lane.b32.xlu1 %v918_v36, %s4115_s25  ;;  %v1617_v50 = vpop.permute.xlu0 %1616  ;;  %v2161_v52 = vsel %vm2159_vm3, %v2128_v47, %v4515_v7 }
 0x176   : > { %v2194_v55 = vsel %vm2192_vm4, %v2161_v52, %v1489_v13  ;;  %v3743_v13 = vpop.f32.mrf.mxu0 }
 0x177   : > { %v4574_v53 = vpop.permute.xlu1 %1106  ;;  %1632 = vrot.lane.b32.xlu0 %v951_v48, %s4122_s18  ;;  %v2227_v59 = vsel %vm2225_vm5, %v2194_v55, %v1617_v50 }
 0x178   : > { %v2260_v2 = vsel %vm2258_vm6, %v2227_v59, %v4521_v9  ;;  %v2096_v49 = vsel %vm352_vm0, %v4380_v12, %v4574_v53  ;;  %v4660_v12 = vld [vmem:[#allocation2 + $0xb2] sm:$0xff] }
 0x179   : > { %1886 = vrot.lane.b32.xlu1 %v1044_v40, %s4118_s15  ;;  %v4581_v56 = vpop.permute.xlu0 %1368  ;;  %v2293_v6 = vsel %vm2291_vm7, %v2260_v2, %v4537_v19  ;;  %v631_v19 = vadd.f32 %v3743_v13, %v4333_v30 }
 0x17b   : > { %v1615_v57 = vpop.permute.xlu1 %1614  ;;  %1384 = vrot.lane.b32.xlu0 %v951_v48, %s4115_s25  ;;  %v697_v28 = vmax.f32 %v631_v19, 0.0 }
 0x17c   : > { %v2226_v62 = vsel %vm2225_vm5, %v2193_v58, %v1615_v57 }
 0x17d   : > { %1762 = vrot.lane.b32.xlu1 %v1044_v40, %s4116_s1  ;;  %v4588_v63 = vpop.permute.xlu0 %1876  ;;  %v2259_v4 = vsel %vm2258_vm6, %v2226_v62, %v4524_v11  ;;  %v2326_v11 = vsel %vm2324_vm8, %v2293_v6, %v2001_v35  ;;  %767 = vst.msk [vmem:[#allocation2 + $0x129] sm:$0xff] %vm352_vm0, %v697_v28  ;;  %v920_v35 = vld [vmem:[#allocation2 + $0x91] sm:$0xff] }
 0x17e   : > { %v2292_v8 = vsel %vm2291_vm7, %v2259_v4, %v4534_v18  ;;  %v625_v18 = vpop.f32.mrf.mxu0  ;;  %v4672_v62 = vld [vmem:[#allocation2 + $0xb0] sm:$0xff] }
 0x17f   : > { %v4592_v3 = vpop.permute.xlu1 %1490  ;;  %1892 = vrot.lane.b32.xlu0 %v1017_v0, %s4118_s15  ;;  %v626_v31 = vadd.f32 %v4333_v30, %v625_v18  ;;  %v952_v18 = vld [vmem:[#allocation2 + $0xa9] sm:$0xff] }
 0x180   : > { %v3746_v4 = vpop.f32.mrf.mxu0 }
 0x181   : > { %1508 = vrot.lane.b32.xlu1 %v951_v48, %s4117_s13  ;;  %v4598_v5 = vpop.permute.xlu0 %1752  ;;  %v696_v33 = vmax.f32 %v626_v31, 0.0 }
 0x183   : > { %v1999_v7 = vpop.permute.xlu1 %1998  ;;  %1768 = vrot.lane.b32.xlu0 %v1017_v0, %s4116_s1  ;;  %766 = vst.msk [vmem:[#allocation2 + $0x121] sm:$0xff] %vm352_vm0, %v696_v33  ;;  %v4711_v33 = vld [vmem:[#allocation2 + $0xc9] sm:$0xff] }
 0x184   : > { %v2325_v9 = vsel %vm2324_vm8, %v2292_v8, %v1999_v7  ;;  %v641_v7 = vadd.f32 %v3746_v4, %v4333_v30 }
 0x185   : > { %2016 = vrot.lane.b32.xlu1 %v1017_v0, %s4120_s23  ;;  %3774 = vmatprep.mubr.msk.f32.mxu0 %vm2373_vm9, %v2325_v9  ;;  %v1109_v10 = vpop.permute.xlu0 %1108  ;;  %v635_v9 = vpop.f32.mrf.mxu0 }
 0x186   : > { %3775 = vmatmul.mubr.msk.f32.vlgmr.msra.gmra.mxu0 %vm2373_vm9, %v2326_v11  ;;  %v2097_v45 = vsel %vm352_vm0, %v4395_v17, %v1109_v10  ;;  %v636_v11 = vadd.f32 %v4333_v30, %v635_v9 }
 0x187   : > { %v4613_v23 = vpop.permute.xlu1 %1366  ;;  %1248 = vrot.lane.b32.xlu0 %v4610_v16, %s4121_s10 }
 0x188   : > { %v698_v19 = vmax.f32 %v636_v11, 0.0 }
 0x189   : > { %1246 = vrot.lane.b32.xlu1 %v4617_v25, %s4121_s10  ;;  %v1621_v32 = vpop.permute.xlu0 %1620 }
 0x18a   : > { %768 = vst.msk [vmem:[#allocation2 + $0x139] sm:$0xff] %vm352_vm0, %v698_v19 }
 0x18b   : > { %v1875_v34 = vpop.permute.xlu1 %1874  ;;  %1122 = vrot.lane.b32.xlu0 %v4617_v25, %s4119_s22 }
 0x18d   : > { %1506 = vrot.lane.b32.xlu1 %v920_v35, %s4117_s13  ;;  %v4627_v36 = vpop.permute.xlu0 %1372 }
 0x18f   : > { %v4629_v37 = vpop.permute.xlu1 %1750  ;;  %1630 = vrot.lane.b32.xlu0 %v920_v35, %s4122_s18 }
 0x191   : > { %2014 = vrot.lane.b32.xlu1 %v1046_v38, %s4120_s23  ;;  %v4633_v39 = vpop.permute.xlu0 %1880 }
 0x193   : > { %v4635_v40 = vpop.permute.xlu1 %1496  ;;  %1124 = vrot.lane.b32.xlu0 %v4610_v16, %s4119_s22 }
 0x195   : > { %1382 = vrot.lane.b32.xlu1 %v920_v35, %s4115_s25  ;;  %v4640_v42 = vpop.permute.xlu0 %1756 }
 0x197   : > { %v2005_v44 = vpop.permute.xlu1 %2004  ;;  %1636 = vrot.lane.b32.xlu0 %v953_v41, %s4122_s18 }
 0x199   : > { %1890 = vrot.lane.b32.xlu1 %v1046_v38, %s4118_s15  ;;  %v1237_v47 = vpop.permute.xlu0 %1236 }
 0x19a   : > { %v2130_v48 = vsel %vm2126_vm2, %v2097_v45, %v1237_v47 }
 0x19b   : > { %v2163_v50 = vsel %vm2159_vm3, %v2130_v48, %v4531_v15  ;;  %v1235_v51 = vpop.permute.xlu1 %1234  ;;  %1388 = vrot.lane.b32.xlu0 %v953_v41, %s4115_s25 }
 0x19c   : > { %v2196_v52 = vsel %vm2192_vm4, %v2163_v50, %v4549_v26  ;;  %v2129_v17 = vsel %vm2126_vm2, %v2096_v49, %v1235_v51  ;;  %v4733_v49 = vld [vmem:[#allocation2 + $0xc0] sm:$0xff] }
 0x19d   : > { %v2229_v54 = vsel %vm2225_vm5, %v2196_v52, %v1621_v32  ;;  %1766 = vrot.lane.b32.xlu1 %v1046_v38, %s4116_s1  ;;  %v1111_v55 = vpop.permute.xlu0 %1110  ;;  %v2162_v57 = vsel %vm2159_vm3, %v2129_v17, %v4528_v14 }
 0x19e   : > { %v2262_v15 = vsel %vm2258_vm6, %v2229_v54, %v4543_v22  ;;  %v2195_v58 = vsel %vm2192_vm4, %v2162_v57, %v4592_v3  ;;  %v2098_v50 = vsel %vm352_vm0, %v4404_v20, %v1111_v55  ;;  %v3749_v54 = vpop.f32.mrf.mxu0  ;;  %v4752_v55 = vld [vmem:[#allocation2 + $0xc1] sm:$0xff] }
 0x19f   : > { %v4662_v53 = vpop.permute.xlu1 %1494  ;;  %1896 = vrot.lane.b32.xlu0 %v4660_v12, %s4118_s15  ;;  %v2295_v22 = vsel %vm2291_vm7, %v2262_v15, %v4588_v63  ;;  %v699_v63 = vmax.f32 %v641_v7, 0.0  ;;  %v651_v20 = vadd.f32 %v3749_v54, %v4333_v30  ;;  %v4803_v54 = vld [vmem:[#allocation2 + $0xc2] sm:$0xff] }
 0x1a0   : > { %v2328_v8 = vsel %vm2324_vm8, %v2295_v22, %v2005_v44 }
 0x1a1   : > { %1512 = vrot.lane.b32.xlu1 %v953_v41, %s4117_s13  ;;  %v1619_v26 = vpop.permute.xlu0 %1618  ;;  %769 = vst.msk [vmem:[#allocation2 + $0x141] sm:$0xff] %vm352_vm0, %v699_v63  ;;  %v4724_v41 = vld [vmem:[#allocation2 + $0xc8] sm:$0xff] }
 0x1a2   : > { %v2228_v59 = vsel %vm2225_vm5, %v2195_v58, %v1619_v26  ;;  %v645_v26 = vpop.f32.mrf.mxu0 }
 0x1a3   : > { %v2261_v14 = vsel %vm2258_vm6, %v2228_v59, %v4540_v21  ;;  %v2003_v0 = vpop.permute.xlu1 %2002  ;;  %1252 = vrot.lane.b32.xlu0 %v4672_v62, %s4121_s10  ;;  %v4686_v21 = vld [vmem:[#allocation2 + $0xa8] sm:$0xff]  ;;  %v646_v59 = vadd.f32 %v4333_v30, %v645_v26 }
 0x1a4   : > { %v2294_v2 = vsel %vm2291_vm7, %v2261_v14, %v1875_v34  ;;  %v4759_v14 = vld [vmem:[#allocation2 + $0xca] sm:$0xff]  ;;  %v3752_v22 = vpop.f32.mrf.mxu0 }
 0x1a5   : > { %v2327_v6 = vsel %vm2324_vm8, %v2294_v2, %v2003_v0  ;;  %2020 = vrot.lane.b32.xlu1 %v4660_v12, %s4120_s23  ;;  %v1113_v3 = vpop.permute.xlu0 %1112  ;;  %v700_v4 = vmax.f32 %v646_v59, 0.0  ;;  %v4827_v59 = vld [vmem:[#allocation2 + $0xe1] sm:$0xff] }
 0x1a6   : > { %3777 = vmatprep.mubr.msk.f32.mxu0 %vm2373_vm9, %v2327_v6  ;;  %v2099_v45 = vsel %vm352_vm0, %v4424_v27, %v1113_v3  ;;  %v661_v6 = vadd.f32 %v3752_v22, %v4333_v30  ;;  %v655_v7 = vpop.f32.mrf.mxu0  ;;  %v4831_v22 = vld [vmem:[#allocation2 + $0xf0] sm:$0xff] }
 0x1a7   : > { %v4689_v10 = vpop.permute.xlu1 %1370  ;;  %1126 = vrot.lane.b32.xlu0 %v4686_v21, %s4119_s22  ;;  %3778 = vmatmul.mubr.msk.f32.gmra.mxu0 %vm2373_vm9, %v2328_v8  ;;  %770 = vst.msk [vmem:[#allocation2 + $0x151] sm:$0xff] %vm352_vm0, %v700_v4  ;;  %v656_v63 = vadd.f32 %v4333_v30, %v655_v7 }
 0x1a8   : > { %3824 = vmatprep.mubr.msk.f32.mxu0 %vm352_vm0, %v4236_v1  ;;  %v4709_v1 = vld [vmem:[#allocation2 + $0xaa] sm:$0xff]  ;;  %v3755_v19 = vpop.f32.mrf.mxu0 }
 0x1a9   : > { %1250 = vrot.lane.b32.xlu1 %v4686_v21, %s4121_s10  ;;  %v1625_v13 = vpop.permute.xlu0 %1624 }
 0x1ab   : > { %v1879_v28 = vpop.permute.xlu1 %1878  ;;  %1634 = vrot.lane.b32.xlu0 %v952_v18, %s4122_s18 }
 0x1ad   : > { %1510 = vrot.lane.b32.xlu1 %v952_v18, %s4117_s13  ;;  %v4703_v31 = vpop.permute.xlu0 %1376 }
 0x1af   : > { %v4705_v32 = vpop.permute.xlu1 %1754  ;;  %1128 = vrot.lane.b32.xlu0 %v4672_v62, %s4119_s22 }
 0x1b1   : > { %2018 = vrot.lane.b32.xlu1 %v4709_v1, %s4120_s23  ;;  %v4715_v34 = vpop.permute.xlu0 %1884 }
 0x1b3   : > { %v4717_v35 = vpop.permute.xlu1 %1500  ;;  %1640 = vrot.lane.b32.xlu0 %v4711_v33, %s4122_s18 }
 0x1b5   : > { %1386 = vrot.lane.b32.xlu1 %v952_v18, %s4115_s25  ;;  %v4722_v38 = vpop.permute.xlu0 %1760 }
 0x1b7   : > { %v2009_v44 = vpop.permute.xlu1 %2008  ;;  %1256 = vrot.lane.b32.xlu0 %v4724_v41, %s4121_s10 }
 0x1b9   : > { %1894 = vrot.lane.b32.xlu1 %v4709_v1, %s4118_s15  ;;  %v1241_v47 = vpop.permute.xlu0 %1240 }
 0x1ba   : > { %v2132_v48 = vsel %vm2126_vm2, %v2099_v45, %v1241_v47  ;;  %v702_v45 = vmax.f32 %v656_v63, 0.0 }
 0x1bb   : > { %v2165_v51 = vsel %vm2159_vm3, %v2132_v48, %v4581_v56  ;;  %v1239_v52 = vpop.permute.xlu1 %1238  ;;  %1130 = vrot.lane.b32.xlu0 %v4733_v49, %s4119_s22  ;;  %v665_v48 = vpop.f32.mrf.mxu0 }
 0x1bc   : > { %v2198_v27 = vsel %vm2192_vm4, %v2165_v51, %v4635_v40  ;;  %v2131_v17 = vsel %vm2126_vm2, %v2098_v50, %v1239_v52  ;;  %v701_v40 = vmax.f32 %v651_v20, 0.0  ;;  %772 = vst.msk [vmem:[#allocation2 + $0x169] sm:$0xff] %vm352_vm0, %v702_v45  ;;  %v666_v51 = vadd.f32 %v4333_v30, %v665_v48  ;;  %v4891_v45 = vld [vmem:[#allocation2 + $0xf1] sm:$0xff] }
 0x1bd   : > { %v2231_v57 = vsel %vm2225_vm5, %v2198_v27, %v1625_v13  ;;  %1516 = vrot.lane.b32.xlu1 %v4711_v33, %s4117_s13  ;;  %v4747_v15 = vpop.permute.xlu0 %1114  ;;  %v2164_v56 = vsel %vm2159_vm3, %v2131_v17, %v4613_v23  ;;  %v4779_v13 = vld [vmem:[#allocation2 + $0xe0] sm:$0xff]  ;;  %v4798_v27 = vld [vmem:[#allocation2 + $0xd8] sm:$0xff] }
 0x1be   : > { %v2264_v0 = vsel %vm2258_vm6, %v2231_v57, %v4598_v5  ;;  %v2197_v23 = vsel %vm2192_vm4, %v2164_v56, %v4662_v53  ;;  %771 = vst.msk [vmem:[#allocation2 + $0x159] sm:$0xff] %vm352_vm0, %v701_v40  ;;  %v703_v53 = vmax.f32 %v661_v6, 0.0  ;;  %v4809_v57 = vld [vmem:[#allocation2 + $0xd9] sm:$0xff]  ;;  %v2100_v6 = vsel %vm352_vm0, %v4471_v46, %v4747_v15 }
 0x1bf   : > { %v4754_v58 = vpop.permute.xlu1 %1498  ;;  %1638 = vrot.lane.b32.xlu0 %v4752_v55, %s4122_s18  ;;  %v2297_v9 = vsel %vm2291_vm7, %v2264_v0, %v4633_v39  ;;  %v671_v39 = vadd.f32 %v3755_v19, %v4333_v30 }
 0x1c0   : > { %773 = vst.msk [vmem:[#allocation2 + $0x171] sm:$0xff] %vm352_vm0, %v703_v53  ;;  %v2330_v47 = vsel %vm2324_vm8, %v2297_v9, %v2009_v44  ;;  %v704_v44 = vmax.f32 %v666_v51, 0.0  ;;  %v4907_v51 = vld [vmem:[#allocation2 + $0x108] sm:$0xff] }
 0x1c1   : > { %2024 = vrot.lane.b32.xlu1 %v4759_v14, %s4120_s23  ;;  %v1623_v2 = vpop.permute.xlu0 %1622  ;;  %v705_v50 = vmax.f32 %v671_v39, 0.0 }
 0x1c2   : > { %v2230_v3 = vsel %vm2225_vm5, %v2197_v23, %v1623_v2  ;;  %774 = vst.msk [vmem:[#allocation2 + $0x181] sm:$0xff] %vm352_vm0, %v704_v44  ;;  %v4913_v44 = vld [vmem:[#allocation2 + $0xf9] sm:$0xff] }
 0x1c3   : > { %v2263_v8 = vsel %vm2258_vm6, %v2230_v3, %v4629_v37  ;;  %v2007_v5 = vpop.permute.xlu1 %2006  ;;  %1132 = vrot.lane.b32.xlu0 %v4724_v41, %s4119_s22  ;;  %775 = vst.msk [vmem:[#allocation2 + $0x189] sm:$0xff] %vm352_vm0, %v705_v50 }
 0x1c4   : > { %v2296_v11 = vsel %vm2291_vm7, %v2263_v8, %v1879_v28 }
 0x1c5   : > { %1254 = vrot.lane.b32.xlu1 %v4733_v49, %s4121_s10  ;;  %v1117_v37 = vpop.permute.xlu0 %1116  ;;  %v2329_v18 = vsel %vm2324_vm8, %v2296_v11, %v2007_v5 }
 0x1c6   : > { %3780 = vmatprep.mubr.msk.f32.mxu1 %vm2373_vm9, %v2329_v18  ;;  %v2101_v23 = vsel %vm352_vm0, %v4466_v43, %v1117_v37 }
 0x1c7   : > { %v4788_v28 = vpop.permute.xlu1 %1374  ;;  %1260 = vrot.lane.b32.xlu0 %v4779_v13, %s4121_s10  ;;  %3781 = vmatmul.mubr.msk.f32.vlgmr.msra.gmra.mxu1 %vm2373_vm9, %v2330_v47  ;;  %v4897_v47 = vld [vmem:[#allocation2 + $0xe2] sm:$0xff] }
 0x1c9   : > { %1514 = vrot.lane.b32.xlu1 %v4752_v55, %s4117_s13  ;;  %v1629_v52 = vpop.permute.xlu0 %1628 }
 0x1cb   : > { %v1883_v17 = vpop.permute.xlu1 %1882  ;;  %1134 = vrot.lane.b32.xlu0 %v4798_v27, %s4119_s22 }
 0x1cd   : > { %2022 = vrot.lane.b32.xlu1 %v4803_v54, %s4120_s23  ;;  %v4807_v30 = vpop.permute.xlu0 %1380 }
 0x1cf   : > { %v4811_v20 = vpop.permute.xlu1 %1758  ;;  %1642 = vrot.lane.b32.xlu0 %v4809_v57, %s4122_s18 }
 0x1d1   : > { %1258 = vrot.lane.b32.xlu1 %v4798_v27, %s4121_s10  ;;  %v4817_v56 = vpop.permute.xlu0 %1888 }
 0x1d3   : > { %v4819_v26 = vpop.permute.xlu1 %1504  ;;  %1136 = vrot.lane.b32.xlu0 %v4779_v13, %s4119_s22 }
 0x1d5   : > { %1770 = vrot.lane.b32.xlu1 %v4709_v1, %s4116_s1  ;;  %v4825_v40 = vpop.permute.xlu0 %1764  ;;  %v4838_v1 = vld [vmem:[#allocation2 + $0xf8] sm:$0xff] }
 0x1d7   : > { %v2013_v0 = vpop.permute.xlu1 %2012  ;;  %1644 = vrot.lane.b32.xlu0 %v4827_v59, %s4122_s18 }
 0x1d9   : > { %1262 = vrot.lane.b32.xlu1 %v4831_v22, %s4121_s10  ;;  %v1245_v2 = vpop.permute.xlu0 %1244 }
 0x1da   : > { %v2134_v4 = vsel %vm2126_vm2, %v2101_v23, %v1245_v2 }
 0x1db   : > { %v2167_v3 = vsel %vm2159_vm3, %v2134_v4, %v4627_v36  ;;  %v1243_v7 = vpop.permute.xlu1 %1242  ;;  %1264 = vrot.lane.b32.xlu0 %v4838_v1, %s4121_s10  ;;  %v4922_v4 = vld [vmem:[#allocation2 + $0x110] sm:$0xff] }
 0x1dc   : > { %v2200_v43 = vsel %vm2192_vm4, %v2167_v3, %v4717_v35  ;;  %v2133_v8 = vsel %vm2126_vm2, %v2100_v6, %v1243_v7 }
 0x1dd   : > { %v2233_v5 = vsel %vm2225_vm5, %v2200_v43, %v1629_v52  ;;  %1390 = vrot.lane.b32.xlu1 %v4752_v55, %s4115_s25  ;;  %v1119_v9 = vpop.permute.xlu0 %1118  ;;  %v2166_v46 = vsel %vm2159_vm3, %v2133_v8, %v4689_v10 }
 0x1de   : > { %v2266_v36 = vsel %vm2258_vm6, %v2233_v5, %v4640_v42  ;;  %v2199_v35 = vsel %vm2192_vm4, %v2166_v46, %v4754_v58  ;;  %v2102_v6 = vsel %vm352_vm0, %v4502_v61, %v1119_v9 }
 0x1df   : > { %v1503_v15 = vpop.permute.xlu1 %1502  ;;  %1772 = vrot.lane.b32.xlu0 %v4660_v12, %s4116_s1  ;;  %v2299_v12 = vsel %vm2291_vm7, %v2266_v36, %v4715_v34 }
 0x1e0   : > { %v2332_v19 = vsel %vm2324_vm8, %v2299_v12, %v2013_v0  ;;  %v4979_v12 = vld [vmem:[#allocation2 + $0xfa] sm:$0xff] }
 0x1e1   : > { %1898 = vrot.lane.b32.xlu1 %v4803_v54, %s4118_s15  ;;  %v1627_v53 = vpop.permute.xlu0 %1626 }
 0x1e2   : > { %v2232_v55 = vsel %vm2225_vm5, %v2199_v35, %v1627_v53 }
 0x1e3   : > { %v2265_v63 = vsel %vm2258_vm6, %v2232_v55, %v4705_v32  ;;  %v2011_v10 = vpop.permute.xlu1 %2010  ;;  %1392 = vrot.lane.b32.xlu0 %v4711_v33, %s4115_s25  ;;  %v4881_v33 = vld [vmem:[#allocation2 + $0xda] sm:$0xff] }
 0x1e4   : > { %v2298_v42 = vsel %vm2291_vm7, %v2265_v63, %v1883_v17  ;;  %v4973_v63 = vld [vmem:[#allocation2 + $0x109] sm:$0xff] }
 0x1e5   : > { %v2331_v11 = vsel %vm2324_vm8, %v2298_v42, %v2011_v10  ;;  %1518 = vrot.lane.b32.xlu1 %v4809_v57, %s4117_s13  ;;  %v1121_v58 = vpop.permute.xlu0 %1120 }
 0x1e6   : > { %3783 = vmatprep.mubr.msk.f32.mxu1 %vm2373_vm9, %v2331_v11  ;;  %v2103_v0 = vsel %vm352_vm0, %v4498_v60, %v1121_v58  ;;  %v4989_v58 = vld [vmem:[#allocation2 + $0x120] sm:$0xff] }
 0x1e7   : > { %v4876_v32 = vpop.permute.xlu1 %1378  ;;  %1900 = vrot.lane.b32.xlu0 %v4759_v14, %s4118_s15  ;;  %3784 = vmatmul.mubr.msk.f32.gmra.mxu1 %vm2373_vm9, %v2332_v19 }
 0x1e9   : > { %2026 = vrot.lane.b32.xlu1 %v4881_v33, %s4120_s23  ;;  %v1633_v34 = vpop.permute.xlu0 %1632 }
 0x1eb   : > { %v1887_v37 = vpop.permute.xlu1 %1886  ;;  %1138 = vrot.lane.b32.xlu0 %v4831_v22, %s4119_s22 }
 0x1ed   : > { %1520 = vrot.lane.b32.xlu1 %v4827_v59, %s4117_s13  ;;  %v4889_v18 = vpop.permute.xlu0 %1384 }
 0x1ef   : > { %v4893_v39 = vpop.permute.xlu1 %1762  ;;  %1646 = vrot.lane.b32.xlu0 %v4891_v45, %s4122_s18 }
 0x1f1   : > { %2028 = vrot.lane.b32.xlu1 %v4897_v47, %s4120_s23  ;;  %v4901_v48 = vpop.permute.xlu0 %1892 }
 0x1f3   : > { %v4903_v50 = vpop.permute.xlu1 %1508  ;;  %1140 = vrot.lane.b32.xlu0 %v4838_v1, %s4119_s22 }
 0x1f5   : > { %1266 = vrot.lane.b32.xlu1 %v4907_v51, %s4121_s10  ;;  %v4911_v52 = vpop.permute.xlu0 %1768 }
 0x1f7   : > { %v2017_v17 = vpop.permute.xlu1 %2016  ;;  %1648 = vrot.lane.b32.xlu0 %v4913_v44, %s4122_s18 }
 0x1f9   : > { %1774 = vrot.lane.b32.xlu1 %v4803_v54, %s4116_s1  ;;  %v1249_v23 = vpop.permute.xlu0 %1248 }
 0x1fa   : > { %v2136_v2 = vsel %vm2126_vm2, %v2103_v0, %v1249_v23 }
 0x1fb   : > { %v2169_v3 = vsel %vm2159_vm3, %v2136_v2, %v4703_v31  ;;  %v1247_v7 = vpop.permute.xlu1 %1246  ;;  %1268 = vrot.lane.b32.xlu0 %v4922_v4, %s4121_s10 }
 0x1fc   : > { %v2202_v60 = vsel %vm2192_vm4, %v2169_v3, %v4819_v26  ;;  %v2135_v54 = vsel %vm2126_vm2, %v2102_v6, %v1247_v7  ;;  %v5006_v6 = vld [vmem:[#allocation2 + $0x128] sm:$0xff] }
 0x1fd   : > { %v2235_v43 = vsel %vm2225_vm5, %v2202_v60, %v1633_v34  ;;  %1394 = vrot.lane.b32.xlu1 %v4809_v57, %s4115_s25  ;;  %v1123_v8 = vpop.permute.xlu0 %1122  ;;  %v2168_v61 = vsel %vm2159_vm3, %v2135_v54, %v4788_v28 }
 0x1fe   : > { %v2268_v31 = vsel %vm2258_vm6, %v2235_v43, %v4722_v38  ;;  %v2201_v26 = vsel %vm2192_vm4, %v2168_v61, %v1503_v15  ;;  %v2104_v3 = vsel %vm352_vm0, %v4553_v29, %v1123_v8 }
 0x1ff   : > { %v1507_v5 = vpop.permute.xlu1 %1506  ;;  %1776 = vrot.lane.b32.xlu0 %v4759_v14, %s4116_s1  ;;  %v2301_v14 = vsel %vm2291_vm7, %v2268_v31, %v4817_v56  ;;  %v4963_v56 = vld [vmem:[#allocation2 + $0xf2] sm:$0xff] }
 0x200   : > { %v2334_v35 = vsel %vm2324_vm8, %v2301_v14, %v2017_v17  ;;  %v4996_v17 = vld [vmem:[#allocation2 + $0x111] sm:$0xff] }
 0x201   : > { %1902 = vrot.lane.b32.xlu1 %v4881_v33, %s4118_s15  ;;  %v1631_v9 = vpop.permute.xlu0 %1630 }
 0x202   : > { %v2234_v46 = vsel %vm2225_vm5, %v2201_v26, %v1631_v9 }
 0x203   : > { %v2267_v57 = vsel %vm2258_vm6, %v2234_v46, %v4811_v20  ;;  %v2015_v36 = vpop.permute.xlu1 %2014  ;;  %1396 = vrot.lane.b32.xlu0 %v4827_v59, %s4115_s25 }
 0x204   : > { %v2300_v38 = vsel %vm2291_vm7, %v2267_v57, %v1887_v37  ;;  %v5051_v57 = vld [vmem:[#allocation2 + $0x121] sm:$0xff] }
 0x205   : > { %v2333_v28 = vsel %vm2324_vm8, %v2300_v38, %v2015_v36  ;;  %1522 = vrot.lane.b32.xlu1 %v4891_v45, %s4117_s13  ;;  %v1125_v15 = vpop.permute.xlu0 %1124  ;;  %v5059_v38 = vld [vmem:[#allocation2 + $0x112] sm:$0xff] }
 0x206   : > { %3786 = vmatprep.mubr.msk.f32.mxu1 %vm2373_vm9, %v2333_v28  ;;  %v2105_v19 = vsel %vm352_vm0, %v4546_v24, %v1125_v15 }
 0x207   : > { %v4958_v20 = vpop.permute.xlu1 %1382  ;;  %1904 = vrot.lane.b32.xlu0 %v4897_v47, %s4118_s15  ;;  %3787 = vmatmul.mubr.msk.f32.gmra.mxu1 %vm2373_vm9, %v2334_v35 }
 0x209   : > { %2030 = vrot.lane.b32.xlu1 %v4963_v56, %s4120_s23  ;;  %v1637_v59 = vpop.permute.xlu0 %1636 }
 0x20b   : > { %v1891_v53 = vpop.permute.xlu1 %1890  ;;  %1142 = vrot.lane.b32.xlu0 %v4907_v51, %s4119_s22 }
 0x20d   : > { %1524 = vrot.lane.b32.xlu1 %v4913_v44, %s4117_s13  ;;  %v4971_v55 = vpop.permute.xlu0 %1388 }
 0x20f   : > { %v4975_v10 = vpop.permute.xlu1 %1766  ;;  %1650 = vrot.lane.b32.xlu0 %v4973_v63, %s4122_s18 }
 0x211   : > { %2032 = vrot.lane.b32.xlu1 %v4979_v12, %s4120_s23  ;;  %v4983_v42 = vpop.permute.xlu0 %1896 }
 0x213   : > { %v4985_v11 = vpop.permute.xlu1 %1512  ;;  %1144 = vrot.lane.b32.xlu0 %v4922_v4, %s4119_s22 }
 0x215   : > { %1270 = vrot.lane.b32.xlu1 %v4989_v58, %s4121_s10  ;;  %v1253_v34 = vpop.permute.xlu0 %1252 }
 0x216   : > { %v2138_v37 = vsel %vm2126_vm2, %v2105_v19, %v1253_v34  ;;  %v5074_v19 = vld [vmem:[#allocation2 + $0x129] sm:$0xff] }
 0x217   : > { %v2171_v0 = vsel %vm2159_vm3, %v2138_v37, %v4807_v30  ;;  %v2021_v23 = vpop.permute.xlu1 %2020  ;;  %1652 = vrot.lane.b32.xlu0 %v4996_v17, %s4122_s18 }
 0x218   : > { %v2204_v2 = vsel %vm2192_vm4, %v2171_v0, %v4903_v50 }
 0x219   : > { %1778 = vrot.lane.b32.xlu1 %v4881_v33, %s4116_s1  ;;  %v1127_v24 = vpop.permute.xlu0 %1126  ;;  %v2237_v30 = vsel %vm2225_vm5, %v2204_v2, %v1637_v59 }
 0x21a   : > { %v2270_v29 = vsel %vm2258_vm6, %v2237_v30, %v4825_v40  ;;  %v2106_v34 = vsel %vm352_vm0, %v4617_v25, %v1127_v24  ;;  %v5089_v24 = vld [vmem:[#allocation2 + $0x140] sm:$0xff] }
 0x21b   : > { %v1251_v7 = vpop.permute.xlu1 %1250  ;;  %1272 = vrot.lane.b32.xlu0 %v5006_v6, %s4121_s10 }
 0x21c   : > { %v2137_v60 = vsel %vm2126_vm2, %v2104_v3, %v1251_v7 }
 0x21d   : > { %v2170_v50 = vsel %vm2159_vm3, %v2137_v60, %v4876_v32  ;;  %1398 = vrot.lane.b32.xlu1 %v4891_v45, %s4115_s25  ;;  %v1635_v33 = vpop.permute.xlu0 %1634  ;;  %v2303_v45 = vsel %vm2291_vm7, %v2270_v29, %v4901_v48  ;;  %v5043_v48 = vld [vmem:[#allocation2 + $0x10a] sm:$0xff]  ;;  %v5121_v29 = vld [vmem:[#allocation2 + $0x122] sm:$0xff] }
 0x21e   : > { %v2203_v54 = vsel %vm2192_vm4, %v2170_v50, %v1507_v5 }
 0x21f   : > { %v2236_v43 = vsel %vm2225_vm5, %v2203_v54, %v1635_v33  ;;  %v1511_v8 = vpop.permute.xlu1 %1510  ;;  %1780 = vrot.lane.b32.xlu0 %v4897_v47, %s4116_s1  ;;  %v2336_v47 = vsel %vm2324_vm8, %v2303_v45, %v2021_v23  ;;  %v5136_v45 = vld [vmem:[#allocation2 + $0x139] sm:$0xff] }
 0x220   : > { %v2269_v61 = vsel %vm2258_vm6, %v2236_v43, %v4893_v39 }
 0x221   : > { %1906 = vrot.lane.b32.xlu1 %v4963_v56, %s4118_s15  ;;  %v1129_v32 = vpop.permute.xlu0 %1128  ;;  %v2302_v31 = vsel %vm2291_vm7, %v2269_v61, %v1891_v53  ;;  %v5068_v53 = vld [vmem:[#allocation2 + $0x138] sm:$0xff] }
 0x222   : > { %v2107_v14 = vsel %vm352_vm0, %v4610_v16, %v1129_v32 }
 0x223   : > { %v2019_v5 = vpop.permute.xlu1 %2018  ;;  %1400 = vrot.lane.b32.xlu0 %v4913_v44, %s4115_s25 }
 0x224   : > { %v2335_v40 = vsel %vm2324_vm8, %v2302_v31, %v2019_v5  ;;  %v5142_v31 = vld [vmem:[#allocation2 + $0x12a] sm:$0xff] }
 0x225   : > { %1526 = vrot.lane.b32.xlu1 %v4973_v63, %s4117_s13  ;;  %3789 = vmatprep.mubr.msk.f32.mxu1 %vm2373_vm9, %v2335_v40  ;;  %v1641_v39 = vpop.permute.xlu0 %1640 }
 0x226   : > { %3790 = vmatmul.mubr.msk.f32.gmra.mxu1 %vm2373_vm9, %v2336_v47 }
 0x227   : > { %v5039_v26 = vpop.permute.xlu1 %1386  ;;  %1908 = vrot.lane.b32.xlu0 %v4979_v12, %s4118_s15 }
 0x229   : > { %2034 = vrot.lane.b32.xlu1 %v5043_v48, %s4120_s23  ;;  %v1257_v44 = vpop.permute.xlu0 %1256 }
 0x22a   : > { %v2140_v28 = vsel %vm2126_vm2, %v2107_v14, %v1257_v44  ;;  %v5151_v44 = vld [vmem:[#allocation2 + $0x150] sm:$0xff] }
 0x22b   : > { %v1895_v9 = vpop.permute.xlu1 %1894  ;;  %1146 = vrot.lane.b32.xlu0 %v4989_v58, %s4119_s22  ;;  %v2173_v59 = vsel %vm2159_vm3, %v2140_v28, %v4889_v18 }
 0x22c   : > { %v2206_v37 = vsel %vm2192_vm4, %v2173_v59, %v4985_v11 }
 0x22d   : > { %1528 = vrot.lane.b32.xlu1 %v4996_v17, %s4117_s13  ;;  %v1131_v46 = vpop.permute.xlu0 %1130  ;;  %v2239_v3 = vsel %vm2225_vm5, %v2206_v37, %v1641_v39 }
 0x22f   : > { %v5053_v36 = vpop.permute.xlu1 %1516  ;;  %1654 = vrot.lane.b32.xlu0 %v5051_v57, %s4122_s18 }
 0x231   : > { %2036 = vrot.lane.b32.xlu1 %v5059_v38, %s4120_s23  ;;  %v1639_v15 = vpop.permute.xlu0 %1638 }
 0x233   : > { %v2025_v35 = vpop.permute.xlu1 %2024  ;;  %1148 = vrot.lane.b32.xlu0 %v5006_v6, %s4119_s22 }
 0x235   : > { %1274 = vrot.lane.b32.xlu1 %v5068_v53, %s4121_s10  ;;  %v5072_v16 = vpop.permute.xlu0 %1132 }
 0x236   : > { %v2109_v28 = vsel %vm352_vm0, %v4672_v62, %v5072_v16 }
 0x237   : > { %v1255_v0 = vpop.permute.xlu1 %1254  ;;  %1656 = vrot.lane.b32.xlu0 %v5074_v19, %s4122_s18 }
 0x238   : > { %v2139_v18 = vsel %vm2126_vm2, %v2106_v34, %v1255_v0  ;;  %v5169_v34 = vld [vmem:[#allocation2 + $0x158] sm:$0xff] }
 0x239   : > { %v2172_v23 = vsel %vm2159_vm3, %v2139_v18, %v4958_v20  ;;  %1782 = vrot.lane.b32.xlu1 %v4963_v56, %s4116_s1  ;;  %v1261_v2 = vpop.permute.xlu0 %1260  ;;  %v2272_v20 = vsel %vm2258_vm6, %v2239_v3, %v4911_v52 }
 0x23a   : > { %v2205_v25 = vsel %vm2192_vm4, %v2172_v23, %v1511_v8  ;;  %v2305_v33 = vsel %vm2291_vm7, %v2272_v20, %v4983_v42 }
 0x23b   : > { %v1515_v11 = vpop.permute.xlu1 %1514  ;;  %1276 = vrot.lane.b32.xlu0 %v5089_v24, %s4121_s10  ;;  %v2238_v7 = vsel %vm2225_vm5, %v2205_v25, %v1639_v15 }
 0x23c   : > { %v2271_v30 = vsel %vm2258_vm6, %v2238_v7, %v4975_v10  ;;  %v2338_v10 = vsel %vm2324_vm8, %v2305_v33, %v2025_v35  ;;  %v2142_v35 = vsel %vm2126_vm2, %v2109_v28, %v1261_v2  ;;  %v5203_v7 = vld [vmem:[#allocation2 + $0x13a] sm:$0xff]  ;;  %v5219_v33 = vld [vmem:[#allocation2 + $0x142] sm:$0xff] }
 0x23d   : > { %1402 = vrot.lane.b32.xlu1 %v4973_v63, %s4115_s25  ;;  %v5100_v56 = vpop.permute.xlu0 %1134  ;;  %v2304_v50 = vsel %vm2291_vm7, %v2271_v30, %v1895_v9  ;;  %v2175_v62 = vsel %vm2159_vm3, %v2142_v35, %v4971_v55 }
 0x23e   : > { %v2208_v23 = vsel %vm2192_vm4, %v2175_v62, %v5053_v36 }
 0x23f   : > { %v2023_v60 = vpop.permute.xlu1 %2022  ;;  %1784 = vrot.lane.b32.xlu0 %v4979_v12, %s4116_s1 }
 0x240   : > { %v2337_v54 = vsel %vm2324_vm8, %v2304_v50, %v2023_v60  ;;  %v5213_v60 = vld [vmem:[#allocation2 + $0x151] sm:$0xff] }
 0x241   : > { %1910 = vrot.lane.b32.xlu1 %v5043_v48, %s4118_s15  ;;  %3792 = vmatprep.mubr.msk.f32.mxu1 %vm2373_vm9, %v2337_v54  ;;  %v1643_v52 = vpop.permute.xlu0 %1642 }
 0x242   : > { %3793 = vmatmul.mubr.msk.f32.gmra.mxu1 %vm2373_vm9, %v2338_v10 }
 0x243   : > { %v1259_v63 = vpop.permute.xlu1 %1258  ;;  %1404 = vrot.lane.b32.xlu0 %v4996_v17, %s4115_s25  ;;  %v2108_v17 = vsel %vm352_vm0, %v4686_v21, %v1131_v46  ;;  %v5157_v46 = vld [vmem:[#allocation2 + $0x141] sm:$0xff] }
 0x244   : > { %v2141_v32 = vsel %vm2126_vm2, %v2108_v17, %v1259_v63  ;;  %v2110_v63 = vsel %vm352_vm0, %v4733_v49, %v5100_v56  ;;  %v5236_v17 = vld [vmem:[#allocation2 + $0x159] sm:$0xff] }
 0x245   : > { %1530 = vrot.lane.b32.xlu1 %v5051_v57, %s4117_s13  ;;  %v5117_v12 = vpop.permute.xlu0 %1136  ;;  %v2174_v40 = vsel %vm2159_vm3, %v2141_v32, %v5039_v26 }
 0x246   : > { %v2207_v39 = vsel %vm2192_vm4, %v2174_v40, %v1515_v11 }
 0x247   : > { %v1771_v42 = vpop.permute.xlu1 %1770  ;;  %1912 = vrot.lane.b32.xlu0 %v5059_v38, %s4118_s15  ;;  %v2240_v26 = vsel %vm2225_vm5, %v2207_v39, %v1643_v52  ;;  %v5225_v52 = vld [vmem:[#allocation2 + $0x168] sm:$0xff] }
 0x248   : > { %v2273_v59 = vsel %vm2258_vm6, %v2240_v26, %v1771_v42 }
 0x249   : > { %2038 = vrot.lane.b32.xlu1 %v5121_v29, %s4120_s23  ;;  %v1645_v43 = vpop.permute.xlu0 %1644 }
 0x24a   : > { %v2241_v2 = vsel %vm2225_vm5, %v2208_v23, %v1645_v43  ;;  %v5295_v23 = vld [vmem:[#allocation2 + $0x169] sm:$0xff] }
 0x24b   : > { %v5125_v8 = vpop.permute.xlu1 %1262  ;;  %1150 = vrot.lane.b32.xlu0 %v5068_v53, %s4119_s22 }
 0x24c   : > { %v2143_v43 = vsel %vm2126_vm2, %v2110_v63, %v5125_v8  ;;  %v5247_v8 = vld [vmem:[#allocation2 + $0x170] sm:$0xff] }
 0x24d   : > { %1532 = vrot.lane.b32.xlu1 %v5074_v19, %s4117_s13  ;;  %v5133_v61 = vpop.permute.xlu0 %1264 }
 0x24f   : > { %v5138_v5 = vpop.permute.xlu1 %1390  ;;  %1658 = vrot.lane.b32.xlu0 %v5136_v45, %s4122_s18 }
 0x250   : > { %v2176_v32 = vsel %vm2159_vm3, %v2143_v43, %v5138_v5 }
 0x251   : > { %2040 = vrot.lane.b32.xlu1 %v5142_v31, %s4120_s23  ;;  %v1773_v21 = vpop.permute.xlu0 %1772 }
 0x252   : > { %v2274_v3 = vsel %vm2258_vm6, %v2241_v2, %v1773_v21 }
 0x253   : > { %v1899_v47 = vpop.permute.xlu1 %1898  ;;  %1152 = vrot.lane.b32.xlu0 %v5089_v24, %s4119_s22 }
 0x254   : > { %v2306_v37 = vsel %vm2291_vm7, %v2273_v59, %v1899_v47 }
 0x255   : > { %1278 = vrot.lane.b32.xlu1 %v5151_v44, %s4121_s10  ;;  %v5155_v9 = vpop.permute.xlu0 %1392 }
 0x257   : > { %v1519_v14 = vpop.permute.xlu1 %1518  ;;  %1660 = vrot.lane.b32.xlu0 %v5157_v46, %s4122_s18 }
 0x258   : > { %v2209_v21 = vsel %vm2192_vm4, %v2176_v32, %v1519_v14  ;;  %v2111_v14 = vsel %vm352_vm0, %v4724_v41, %v5117_v12 }
 0x259   : > { %1786 = vrot.lane.b32.xlu1 %v5043_v48, %s4116_s1  ;;  %v1901_v15 = vpop.permute.xlu0 %1900  ;;  %v2144_v28 = vsel %vm2126_vm2, %v2111_v14, %v5133_v61 }
 0x25b   : > { %v2027_v0 = vpop.permute.xlu1 %2026  ;;  %1280 = vrot.lane.b32.xlu0 %v5169_v34, %s4121_s10 }
 0x25c   : > { %v2339_v18 = vsel %vm2324_vm8, %v2306_v37, %v2027_v0 }
 0x25d   : > { %1406 = vrot.lane.b32.xlu1 %v5051_v57, %s4115_s25  ;;  %3795 = vmatprep.mubr.msk.f32.mxu1 %vm2373_vm9, %v2339_v18  ;;  %v5180_v48 = vpop.permute.xlu0 %1138  ;;  %v2307_v57 = vsel %vm2291_vm7, %v2274_v3, %v1901_v15  ;;  %v2177_v15 = vsel %vm2159_vm3, %v2144_v28, %v5155_v9  ;;  %v5285_v18 = vld [vmem:[#allocation2 + $0x152] sm:$0xff]  ;;  %v5361_v28 = vld [vmem:[#allocation2 + $0x16a] sm:$0xff] }
 0x25f   : > { %v1521_v16 = vpop.permute.xlu1 %1520  ;;  %1788 = vrot.lane.b32.xlu0 %v5059_v38, %s4116_s1 }
 0x260   : > { %v2210_v59 = vsel %vm2192_vm4, %v2177_v15, %v1521_v16 }
 0x261   : > { %1914 = vrot.lane.b32.xlu1 %v5121_v29, %s4118_s15  ;;  %v1647_v55 = vpop.permute.xlu0 %1646 }
 0x262   : > { %v2242_v49 = vsel %vm2225_vm5, %v2209_v21, %v1647_v55  ;;  %v5301_v55 = vld [vmem:[#allocation2 + $0x15a] sm:$0xff] }
 0x263   : > { %v2029_v25 = vpop.permute.xlu1 %2028  ;;  %1408 = vrot.lane.b32.xlu0 %v5074_v19, %s4115_s25 }
 0x264   : > { %v2340_v11 = vsel %vm2324_vm8, %v2307_v57, %v2029_v25  ;;  %v874_v25 = vld [vmem:[#allocation2 + $0x180] sm:$0xff] }
 0x265   : > { %1534 = vrot.lane.b32.xlu1 %v5136_v45, %s4117_s13  ;;  %3796 = vmatmul.mubr.msk.f32.gmra.mxu1 %vm2373_vm9, %v2340_v11  ;;  %v5197_v36 = vpop.permute.xlu0 %1140  ;;  %v2112_v11 = vsel %vm352_vm0, %v4798_v27, %v5180_v48 }
 0x267   : > { %v5199_v38 = vpop.permute.xlu1 %1266  ;;  %1916 = vrot.lane.b32.xlu0 %v5142_v31, %s4118_s15 }
 0x269   : > { %2042 = vrot.lane.b32.xlu1 %v5203_v7, %s4120_s23  ;;  %v1649_v19 = vpop.permute.xlu0 %1648 }
 0x26a   : > { %v2243_v41 = vsel %vm2225_vm5, %v2210_v59, %v1649_v19  ;;  %v970_v59 = vld [vmem:[#allocation2 + $0x181] sm:$0xff] }
 0x26b   : > { %v1775_v30 = vpop.permute.xlu1 %1774  ;;  %1154 = vrot.lane.b32.xlu0 %v5151_v44, %s4119_s22 }
 0x26c   : > { %v2275_v47 = vsel %vm2258_vm6, %v2242_v49, %v1775_v30  ;;  %v2145_v30 = vsel %vm2126_vm2, %v2112_v11, %v5199_v38  ;;  %v875_v38 = vld [vmem:[#allocation2 + $0x188] sm:$0xff] }
 0x26d   : > { %1536 = vrot.lane.b32.xlu1 %v5157_v46, %s4117_s13  ;;  %v5211_v20 = vpop.permute.xlu0 %1268 }
 0x26f   : > { %v5215_v50 = vpop.permute.xlu1 %1394  ;;  %1662 = vrot.lane.b32.xlu0 %v5213_v60, %s4122_s18 }
 0x271   : > { %2044 = vrot.lane.b32.xlu1 %v5219_v33, %s4120_s23  ;;  %v1777_v54 = vpop.permute.xlu0 %1776 }
 0x273   : > { %v1903_v10 = vpop.permute.xlu1 %1902  ;;  %1156 = vrot.lane.b32.xlu0 %v5169_v34, %s4119_s22 }
 0x274   : > { %v2308_v39 = vsel %vm2291_vm7, %v2275_v47, %v1903_v10  ;;  %v2178_v10 = vsel %vm2159_vm3, %v2145_v30, %v5215_v50  ;;  %v877_v30 = vld [vmem:[#allocation2 + $0x1a0] sm:$0xff] }
 0x275   : > { %1282 = vrot.lane.b32.xlu1 %v5225_v52, %s4121_s10  ;;  %v5232_v42 = vpop.permute.xlu0 %1396 }
 0x277   : > { %v1523_v40 = vpop.permute.xlu1 %1522  ;;  %1664 = vrot.lane.b32.xlu0 %v5236_v17, %s4122_s18 }
 0x278   : > { %v2211_v43 = vsel %vm2192_vm4, %v2178_v10, %v1523_v40  ;;  %v2113_v40 = vsel %vm352_vm0, %v4779_v13, %v5197_v36 }
 0x279   : > { %1790 = vrot.lane.b32.xlu1 %v5121_v29, %s4116_s1  ;;  %v1905_v56 = vpop.permute.xlu0 %1904 }
 0x27b   : > { %v2031_v26 = vpop.permute.xlu1 %2030  ;;  %1284 = vrot.lane.b32.xlu0 %v5247_v8, %s4121_s10 }
 0x27c   : > { %v2341_v5 = vsel %vm2324_vm8, %v2308_v39, %v2031_v26 }
 0x27d   : > { %1410 = vrot.lane.b32.xlu1 %v5136_v45, %s4115_s25  ;;  %3798 = vmatprep.mubr.msk.f32.mxu1 %vm2373_vm9, %v2341_v5  ;;  %v5259_v29 = vpop.permute.xlu0 %1142  ;;  %v2276_v45 = vsel %vm2258_vm6, %v2243_v41, %v1777_v54  ;;  %v5315_v54 = vld [vmem:[#allocation2 + $0x171] sm:$0xff] }
 0x27e   : > { %v2309_v37 = vsel %vm2291_vm7, %v2276_v45, %v1905_v56  ;;  %v2146_v56 = vsel %vm2126_vm2, %v2113_v40, %v5211_v20 }
 0x27f   : > { %v1525_v35 = vpop.permute.xlu1 %1524  ;;  %1792 = vrot.lane.b32.xlu0 %v5142_v31, %s4116_s1  ;;  %v2179_v47 = vsel %vm2159_vm3, %v2146_v56, %v5232_v42  ;;  %v972_v56 = vld [vmem:[#allocation2 + $0x199] sm:$0xff] }
 0x280   : > { %v2212_v26 = vsel %vm2192_vm4, %v2179_v47, %v1525_v35 }
 0x281   : > { %1918 = vrot.lane.b32.xlu1 %v5203_v7, %s4118_s15  ;;  %v1651_v12 = vpop.permute.xlu0 %1650 }
 0x282   : > { %v2244_v27 = vsel %vm2225_vm5, %v2211_v43, %v1651_v12  ;;  %v5373_v12 = vld [vmem:[#allocation2 + $0x172] sm:$0xff] }
 0x283   : > { %v2033_v61 = vpop.permute.xlu1 %2032  ;;  %1412 = vrot.lane.b32.xlu0 %v5157_v46, %s4115_s25 }
 0x284   : > { %v2342_v9 = vsel %vm2324_vm8, %v2309_v37, %v2033_v61  ;;  %v876_v37 = vld [vmem:[#allocation2 + $0x198] sm:$0xff] }
 0x285   : > { %1538 = vrot.lane.b32.xlu1 %v5213_v60, %s4117_s13  ;;  %3799 = vmatmul.mubr.msk.f32.gmra.mxu1 %vm2373_vm9, %v2342_v9  ;;  %v5279_v31 = vpop.permute.xlu0 %1144  ;;  %v2114_v9 = vsel %vm352_vm0, %v4831_v22, %v5259_v29 }
 0x287   : > { %v5281_v0 = vpop.permute.xlu1 %1270  ;;  %1920 = vrot.lane.b32.xlu0 %v5219_v33, %s4118_s15 }
 0x289   : > { %2046 = vrot.lane.b32.xlu1 %v5285_v18, %s4120_s23  ;;  %v1653_v46 = vpop.permute.xlu0 %1652 }
 0x28a   : > { %v2245_v13 = vsel %vm2225_vm5, %v2212_v26, %v1653_v46  ;;  %v973_v26 = vld [vmem:[#allocation2 + $0x1a1] sm:$0xff] }
 0x28b   : > { %v1779_v62 = vpop.permute.xlu1 %1778  ;;  %1158 = vrot.lane.b32.xlu0 %v5225_v52, %s4119_s22 }
 0x28c   : > { %v2277_v32 = vsel %vm2258_vm6, %v2244_v27, %v1779_v62  ;;  %v2147_v62 = vsel %vm2126_vm2, %v2114_v9, %v5281_v0  ;;  %v4007_v9 = vld [vmem:[%s4233_s24 + $0x18] sm:$0xff] }
 0x28d   : > { %1540 = vrot.lane.b32.xlu1 %v5236_v17, %s4117_s13  ;;  %v5293_v16 = vpop.permute.xlu0 %1272 }
 0x28f   : > { %v5297_v2 = vpop.permute.xlu1 %1398  ;;  %1666 = vrot.lane.b32.xlu0 %v5295_v23, %s4122_s18 }
 0x291   : > { %2048 = vrot.lane.b32.xlu1 %v5301_v55, %s4120_s23  ;;  %v1781_v3 = vpop.permute.xlu0 %1780 }
 0x293   : > { %v1907_v57 = vpop.permute.xlu1 %1906  ;;  %1160 = vrot.lane.b32.xlu0 %v5247_v8, %s4119_s22 }
 0x294   : > { %v2310_v21 = vsel %vm2291_vm7, %v2277_v32, %v1907_v57  ;;  %v2180_v57 = vsel %vm2159_vm3, %v2147_v62, %v5297_v2 }
 0x295   : > { %1286 = vrot.lane.b32.xlu1 %v874_v25, %s4121_s10  ;;  %v5311_v19 = vpop.permute.xlu0 %1400 }
 0x297   : > { %v1527_v63 = vpop.permute.xlu1 %1526  ;;  %1668 = vrot.lane.b32.xlu0 %v5315_v54, %s4122_s18 }
 0x298   : > { %v2213_v11 = vsel %vm2192_vm4, %v2180_v57, %v1527_v63  ;;  %v2115_v63 = vsel %vm352_vm0, %v4838_v1, %v5279_v31  ;;  %v4008_v57 = vld [vmem:[%s4233_s24 + $0x20] sm:$0xff] }
 0x299   : > { %1794 = vrot.lane.b32.xlu1 %v5203_v7, %s4116_s1  ;;  %v1909_v48 = vpop.permute.xlu0 %1908  ;;  %v2148_v27 = vsel %vm2126_vm2, %v2115_v63, %v5293_v16  ;;  %v4011_v63 = vld [vmem:[%s4233_s24 + $0x38] sm:$0xff] }
 0x29b   : > { %v2035_v49 = vpop.permute.xlu1 %2034  ;;  %1288 = vrot.lane.b32.xlu0 %v875_v38, %s4121_s10 }
 0x29c   : > { %v2343_v50 = vsel %vm2324_vm8, %v2310_v21, %v2035_v49 }
 0x29d   : > { %1414 = vrot.lane.b32.xlu1 %v5213_v60, %s4115_s25  ;;  %3801 = vmatprep.mubr.msk.f32.mxu1 %vm2373_vm9, %v2343_v50  ;;  %v5335_v7 = vpop.permute.xlu0 %1146  ;;  %v2278_v60 = vsel %vm2258_vm6, %v2245_v13, %v1781_v3  ;;  %v971_v3 = vld [vmem:[#allocation2 + $0x189] sm:$0xff] }
 0x29e   : > { %v2311_v5 = vsel %vm2291_vm7, %v2278_v60, %v1909_v48  ;;  %v2181_v48 = vsel %vm2159_vm3, %v2148_v27, %v5311_v19  ;;  %v1066_v50 = vld [vmem:[#allocation2 + $0x182] sm:$0xff] }
 0x29f   : > { %v1529_v39 = vpop.permute.xlu1 %1528  ;;  %1796 = vrot.lane.b32.xlu0 %v5219_v33, %s4116_s1  ;;  %v2728_v60 = vld [vmem:[%s5868_s7] sm:$0xff] }
 0x2a0   : > { %v2214_v1 = vsel %vm2192_vm4, %v2181_v48, %v1529_v39  ;;  %v1067_v39 = vld [vmem:[#allocation2 + $0x18a] sm:$0xff]  ;;  %3822 = vmatprep.subr.mxu0 %v2728_v60  ;;  %v4012_v48 = vld [vmem:[%s4233_s24 + $0x40] sm:$0xff] }
 0x2a1   : > { %1922 = vrot.lane.b32.xlu1 %v5285_v18, %s4118_s15  ;;  %v1655_v36 = vpop.permute.xlu0 %1654  ;;  %3823 = vmatpush3.msra.mxu0 %v2728_v60 }
 0x2a2   : > { %v2246_v22 = vsel %vm2225_vm5, %v2213_v11, %v1655_v36 }
 0x2a3   : > { %v2037_v20 = vpop.permute.xlu1 %2036  ;;  %1416 = vrot.lane.b32.xlu0 %v5236_v17, %s4115_s25 }
 0x2a4   : > { %v2344_v42 = vsel %vm2324_vm8, %v2311_v5, %v2037_v20  ;;  %v2727_v5 = vld [vmem:[%s5867_s6] sm:$0xff] }
 0x2a5   : > { %1542 = vrot.lane.b32.xlu1 %v5295_v23, %s4117_s13  ;;  %3802 = vmatmul.mubr.msk.f32.gmra.mxu1 %vm2373_vm9, %v2344_v42  ;;  %v5355_v33 = vpop.permute.xlu0 %1148  ;;  %v2116_v42 = vsel %vm352_vm0, %v4907_v51, %v5335_v7  ;;  %v4006_v51 = vld [vmem:[%s4233_s24 + $0x10] sm:$0xff] }
 0x2a6   : > { %3872 = vmatprep.subr.mxu1 %v2727_v5  ;;  %v2117_v11 = vsel %vm352_vm0, %v4922_v4, %v5355_v33  ;;  %v4010_v4 = vld [vmem:[%s4233_s24 + $0x30] sm:$0xff] }
 0x2a7   : > { %v5357_v14 = vpop.permute.xlu1 %1274  ;;  %1924 = vrot.lane.b32.xlu0 %v5301_v55, %s4118_s15  ;;  %3873 = vmatpush3.msra.mxu1 %v2727_v5  ;;  %v4020_v5 = vld [vmem:[%s4233_s24 + $0x80] sm:$0xff] }
 0x2a9   : > { %2050 = vrot.lane.b32.xlu1 %v5361_v28, %s4120_s23  ;;  %v1657_v17 = vpop.permute.xlu0 %1656 }
 0x2aa   : > { %v2247_v31 = vsel %vm2225_vm5, %v2214_v1, %v1657_v17 }
 0x2ab   : > { %v1783_v15 = vpop.permute.xlu1 %1782  ;;  %1162 = vrot.lane.b32.xlu0 %v874_v25, %s4119_s22 }
 0x2ac   : > { %v2279_v10 = vsel %vm2258_vm6, %v2246_v22, %v1783_v15  ;;  %v2149_v15 = vsel %vm2126_vm2, %v2116_v42, %v5357_v14 }
 0x2ad   : > { %1544 = vrot.lane.b32.xlu1 %v5315_v54, %s4117_s13  ;;  %v5368_v35 = vpop.permute.xlu0 %1276 }
 0x2ae   : > { %v2150_v22 = vsel %vm2126_vm2, %v2117_v11, %v5368_v35  ;;  %v4026_v11 = vld [vmem:[%s4233_s24 + $0xb0] sm:$0xff] }
 0x2af   : > { %v5370_v41 = vpop.permute.xlu1 %1402  ;;  %1670 = vrot.lane.b32.xlu0 %v970_v59, %s4122_s18 }
 0x2b1   : > { %2052 = vrot.lane.b32.xlu1 %v5373_v12, %s4120_s23  ;;  %v1785_v45 = vpop.permute.xlu0 %1784 }
 0x2b3   : > { %v1911_v61 = vpop.permute.xlu1 %1910  ;;  %1164 = vrot.lane.b32.xlu0 %v875_v38, %s4119_s22  ;;  %v2280_v38 = vsel %vm2258_vm6, %v2247_v31, %v1785_v45  ;;  %v4013_v31 = vld [vmem:[%s4233_s24 + $0x48] sm:$0xff] }
 0x2b4   : > { %v2312_v0 = vsel %vm2291_vm7, %v2279_v10, %v1911_v61  ;;  %v1069_v61 = vld [vmem:[#allocation2 + $0x1a2] sm:$0xff] }
 0x2b5   : > { %1290 = vrot.lane.b32.xlu1 %v876_v37, %s4121_s10  ;;  %v5382_v46 = vpop.permute.xlu0 %1404 }
 0x2b6   : > { %v2183_v10 = vsel %vm2159_vm3, %v2150_v22, %v5382_v46 }
 0x2b7   : > { %v5388_v25 = vpop.permute.xlu1 %1530  ;;  %1672 = vrot.lane.b32.xlu0 %v971_v3, %s4122_s18 }
 0x2b9   : > { %1798 = vrot.lane.b32.xlu1 %v5285_v18, %s4116_s1  ;;  %v1913_v29 = vpop.permute.xlu0 %1912 }
 0x2ba   : > { %v2313_v16 = vsel %vm2291_vm7, %v2280_v38, %v1913_v29  ;;  %v4009_v29 = vld [vmem:[%s4233_s24 + $0x28] sm:$0xff]  ;;  %v4014_v38 = vld [vmem:[%s4233_s24 + $0x50] sm:$0xff] }
 0x2bb   : > { %v2039_v43 = vpop.permute.xlu1 %2038  ;;  %1292 = vrot.lane.b32.xlu0 %v877_v30, %s4121_s10 }
 0x2bc   : > { %v2345_v2 = vsel %vm2324_vm8, %v2312_v0, %v2039_v43 }
 0x2bd   : > { %1418 = vrot.lane.b32.xlu1 %v5295_v23, %s4115_s25  ;;  %3804 = vmatprep.mubr.msk.f32.mxu1 %vm2373_vm9, %v2345_v2  ;;  %v5405_v18 = vpop.permute.xlu0 %1150 }
 0x2bf   : > { %v5411_v32 = vpop.permute.xlu1 %1532  ;;  %1800 = vrot.lane.b32.xlu0 %v5301_v55, %s4116_s1 }
 0x2c0   : > { %v2216_v33 = vsel %vm2192_vm4, %v2183_v10, %v5411_v32 }
 0x2c1   : > { %1926 = vrot.lane.b32.xlu1 %v5361_v28, %s4118_s15  ;;  %v1659_v23 = vpop.permute.xlu0 %1658 }
 0x2c3   : > { %v2041_v21 = vpop.permute.xlu1 %2040  ;;  %1420 = vrot.lane.b32.xlu0 %v5315_v54, %s4115_s25 }
 0x2c4   : > { %v2346_v19 = vsel %vm2324_vm8, %v2313_v16, %v2041_v21  ;;  %v4015_v21 = vld [vmem:[%s4233_s24 + $0x58] sm:$0xff] }
 0x2c5   : > { %1546 = vrot.lane.b32.xlu1 %v970_v59, %s4117_s13  ;;  %3805 = vmatmul.mubr.msk.f32.gmra.mxu1 %vm2373_vm9, %v2346_v19  ;;  %v5426_v55 = vpop.permute.xlu0 %1152  ;;  %v4005_v59 = vld [vmem:[%s4233_s24 + $0x8] sm:$0xff] }
 0x2c6   : > { %3825 = vmatmul.mubr.msk.f32.vlgmr.msra.gmra.mxu0 %vm352_vm0, %v4005_v59  ;;  %v4021_v59 = vld [vmem:[%s4233_s24 + $0x88] sm:$0xff] }
 0x2c7   : > { %v5428_v49 = vpop.permute.xlu1 %1278  ;;  %1928 = vrot.lane.b32.xlu0 %v5373_v12, %s4118_s15  ;;  %3827 = vmatprep.mubr.msk.f32.mxu0 %vm352_vm0, %v4006_v51 }
 0x2c9   : > { %2054 = vrot.lane.b32.xlu1 %v1066_v50, %s4120_s23  ;;  %v1661_v40 = vpop.permute.xlu0 %1660 }
 0x2ca   : > { %3828 = vmatmul.mubr.msk.f32.gmra.mxu0 %vm352_vm0, %v4007_v9  ;;  %v2249_v43 = vsel %vm2225_vm5, %v2216_v33, %v1661_v40 }
 0x2cb   : > { %v1787_v47 = vpop.permute.xlu1 %1786  ;;  %1548 = vrot.lane.b32.xlu0 %v971_v3, %s4117_s13  ;;  %3830 = vmatprep.mubr.msk.f32.mxu0 %vm352_vm0, %v4008_v57  ;;  %s4123_s13 = smov [#allocation5]  }
 0x2cd   : > { %1674 = vrot.lane.b32.xlu1 %v972_v56, %s4122_s18  ;;  %v5435_v54 = vpop.permute.xlu0 %1280  ;;  %v4017_v56 = vld [vmem:[%s4233_s24 + $0x68] sm:$0xff] }
 0x2ce   : > { %3831 = vmatmul.mubr.msk.f32.gmra.mxu0 %vm352_vm0, %v4009_v29  ;;  %v4027_v29 = vld [vmem:[%s4233_s24 + $0xb8] sm:$0xff] }
 0x2cf   : > { %v5437_v13 = vpop.permute.xlu1 %1406  ;;  %2056 = vrot.lane.b32.xlu0 %v1067_v39, %s4120_s23  ;;  %3833 = vmatprep.mubr.msk.f32.mxu0 %vm352_vm0, %v4010_v4  ;;  %v4028_v4 = vld [vmem:[%s4233_s24 + $0xc0] sm:$0xff] }
 0x2d1   : > { %1676 = vrot.lane.b32.xlu1 %v973_v26, %s4122_s18  ;;  %v1789_v36 = vpop.permute.xlu0 %1788  ;;  %s3565_s18 = sshll.u32 %s4104_s29, 12 }
 0x2d2   : > { %v2282_v35 = vsel %vm2258_vm6, %v2249_v43, %v1789_v36  ;;  %3834 = vmatmul.mubr.msk.f32.gmra.mxu0 %vm352_vm0, %v4011_v63  ;;  %v4019_v36 = vld [vmem:[%s4233_s24 + $0x78] sm:$0xff]  ;;  %v4029_v43 = vld [vmem:[%s4233_s24 + $0xc8] sm:$0xff]  ;;  %s5805_s10 = scalar_lea.hbm %s5869_s8, %s3565_s18 }
 0x2d3   : > { %v1915_v20 = vpop.permute.xlu1 %1914  ;;  %1802 = vrot.lane.b32.xlu0 %v5361_v28, %s4116_s1  ;;  %v2182_v28 = vsel %vm2159_vm3, %v2149_v15, %v5370_v41  ;;  %3836 = vmatprep.mubr.msk.f32.mxu0 %vm352_vm0, %v4012_v48  ;;  %v4032_v48 = vld [vmem:[%s4233_s24 + $0xe0] sm:$0xff] }
 0x2d4   : > { %v2215_v7 = vsel %vm2192_vm4, %v2182_v28, %v5388_v25 }
 0x2d5   : > { %1804 = vrot.lane.b32.xlu1 %v5373_v12, %s4116_s1  ;;  %v5454_v17 = vpop.permute.xlu0 %1408  ;;  %v1068_v12 = vld [vmem:[#allocation2 + $0x19a] sm:$0xff]  ;;  %v2248_v14 = vsel %vm2225_vm5, %v2215_v7, %v1659_v23  ;;  %v4022_v7 = vld [vmem:[%s4233_s24 + $0x90] sm:$0xff] }
 0x2d6   : > { %v2281_v41 = vsel %vm2258_vm6, %v2248_v14, %v1787_v47  ;;  %3837 = vmatmul.mubr.msk.f32.gmra.mxu0 %vm352_vm0, %v4013_v31  ;;  %v4023_v14 = vld [vmem:[%s4233_s24 + $0x98] sm:$0xff]  ;;  %v4033_v31 = vld [vmem:[%s4233_s24 + $0xe8] sm:$0xff] }
 0x2d7   : > { %v5462_v45 = vpop.permute.xlu1 %1534  ;;  %1930 = vrot.lane.b32.xlu0 %v1066_v50, %s4118_s15  ;;  %v2314_v62 = vsel %vm2291_vm7, %v2281_v41, %v1915_v20  ;;  %3839 = vmatprep.mubr.msk.f32.mxu0 %vm352_vm0, %v4014_v38  ;;  %v4016_v50 = vld [vmem:[%s4233_s24 + $0x60] sm:$0xff]  ;;  %v2118_v20 = vsel %vm352_vm0, %v4989_v58, %v5405_v18 }
 0x2d8   : > { %v2151_v15 = vsel %vm2126_vm2, %v2118_v20, %v5428_v49  ;;  %v4024_v41 = vld [vmem:[%s4233_s24 + $0xa0] sm:$0xff] }
 0x2d9   : > { %1932 = vrot.lane.b32.xlu1 %v1067_v39, %s4118_s15  ;;  %v1917_v37 = vpop.permute.xlu0 %1916  ;;  %v4018_v39 = vld [vmem:[%s4233_s24 + $0x70] sm:$0xff]  ;;  %v2184_v28 = vsel %vm2159_vm3, %v2151_v15, %v5437_v13  ;;  %s297_s15 = sand.u32 1, %s4096_s27  }
 0x2da   : > { %v2315_v46 = vsel %vm2291_vm7, %v2282_v35, %v1917_v37  ;;  %3840 = vmatmul.mubr.msk.f32.gmra.mxu0 %vm352_vm0, %v4015_v21  ;;  %v2217_v58 = vsel %vm2192_vm4, %v2184_v28, %v5462_v45  ;;  %v2119_v45 = vsel %vm352_vm0, %v5006_v6, %v5426_v55  ;;  %v4030_v35 = vld [vmem:[%s4233_s24 + $0xd0] sm:$0xff]  ;;  %s5815_s29 = scalar_lea.sflag [#allocation6], %s297_s15 }
 0x2db   : > { %v2043_v3 = vpop.permute.xlu1 %2042  ;;  %2058 = vrot.lane.b32.xlu0 %v1068_v12, %s4120_s23  ;;  %3842 = vmatprep.mubr.msk.f32.mxu0 %vm352_vm0, %v4016_v50 }
 0x2dc   : > { %v2347_v25 = vsel %vm2324_vm8, %v2314_v62, %v2043_v3  ;;  %v2152_v62 = vsel %vm2126_vm2, %v2119_v45, %v5435_v54  ;;  %v4025_v3 = vld [vmem:[%s4233_s24 + $0xa8] sm:$0xff] }
 0x2dd   : > { %2060 = vrot.lane.b32.xlu1 %v1069_v61, %s4120_s23  ;;  %3807 = vmatprep.mubr.msk.f32.mxu1 %vm2373_vm9, %v2347_v25  ;;  %v5484_v30 = vpop.permute.xlu0 %1154  ;;  %v2185_v57 = vsel %vm2159_vm3, %v2152_v62, %v5454_v17  ;;  %s3424_s23 = sshll.u32 %s297_s15, 8 }
 0x2de   : > { %3843 = vmatmul.mubr.msk.f32.gmra.mxu0 %vm352_vm0, %v4017_v56  ;;  %v2120_v56 = vsel %vm352_vm0, %v5068_v53, %v5484_v30  ;;  %s5736_s11 = scalar_lea.vmem [#allocation5], %s3424_s23 }
 0x2df   : > { %v5492_v0 = vpop.permute.xlu1 %1536  ;;  %3845 = vmatprep.mubr.msk.f32.mxu0 %vm352_vm0, %v4018_v39  ;;  %s3324_s19 = sshll.u32 %s5736_s11, 4  ;;  %s5809_s19 = int_to_ptr.vmem [resolvable:$true] %s3324_s19 }
 0x2e0   : > { %v2218_v6 = vsel %vm2192_vm4, %v2185_v57, %v5492_v0  ;;  %s4036_s21 = scalar_lea.vmem %s5809_s19, 4096 }
 0x2e1   : > { %v1663_v2 = vpop.permute.xlu0 %1662  ;;  %p4037_p12 = scmp.ne.s32.totalorder %s5809_s19, %s4036_s21 }
 0x2e2   : > { %3846 = vmatmul.mubr.msk.f32.gmra.mxu0 %vm352_vm0, %v4019_v36  ;;  %v2250_v18 = vsel %vm2225_vm5, %v2217_v58, %v1663_v2 }
 0x2e3   : > { %v2045_v27 = vpop.permute.xlu1 %2044  ;;  %3848 = vmatprep.mubr.msk.f32.mxu0 %vm352_vm0, %v4020_v5  ;;  %p4038_p13 = pnand %p4037_p12, %p4210_p4 }
 0x2e4   : > { %v2348_v32 = vsel %vm2324_vm8, %v2315_v46, %v2045_v27  ;;  %v4031_v46 = vld [vmem:[%s4233_s24 + $0xd8] sm:$0xff] }
 0x2e5   : > { %3808 = vmatmul.mubr.msk.f32.gmra.mxu1 %vm2373_vm9, %v2348_v32  ;;  %v5507_v1 = vpop.permute.xlu0 %1156  ;;  %p4039_p0 = pneg %p4038_p13 }
 0x2e6   : > { %3849 = vmatmul.mubr.msk.f32.gmra.mxu0 %vm352_vm0, %v4021_v59  ;;  %v2121_v30 = vsel %vm352_vm0, %v5089_v24, %v5507_v1 }
 0x2e7   : > { %v5511_v23 = vpop.permute.xlu1 %1282  ;;  %3851 = vmatprep.mubr.msk.f32.mxu0 %vm352_vm0, %v4022_v7 }
 0x2e9   : > { %v1665_v16 = vpop.permute.xlu0 %1664 }
 0x2ea   : > { %3852 = vmatmul.mubr.msk.f32.gmra.mxu0 %vm352_vm0, %v4023_v14  ;;  %v2251_v55 = vsel %vm2225_vm5, %v2218_v6, %v1665_v16  ;;  %v4034_v16 = vld [vmem:[%s4233_s24 + $0xf0] sm:$0xff] }
 0x2eb   : > { %v1791_v19 = vpop.permute.xlu1 %1790  ;;  %3854 = vmatprep.mubr.msk.f32.mxu0 %vm352_vm0, %v4024_v41 }
 0x2ec   : > { %v2283_v49 = vsel %vm2258_vm6, %v2250_v18, %v1791_v19  ;;  %v4035_v19 = vld [vmem:[%s4233_s24 + $0xf8] sm:$0xff]  ;;  %s4040_s24 = sshll.u32 %s4123_s13, 4  ;;  %s4041_s24 = int_to_ptr.vmem [resolvable:$false] %s4040_s24 }
 0x2ed   : > { %v5519_v40 = vpop.permute.xlu0 %1284  ;;  %s4042_s1 = scalar_lea.vmem %s4041_s24, 8192  ;;  %p4043_p1 = scmp.lt.s32.totalorder %s5809_s19, %s4041_s24 }
 0x2ee   : > { %3855 = vmatmul.mubr.msk.f32.gmra.mxu0 %vm352_vm0, %v4025_v3  ;;  %p4044_p2 = scmp.lt.s32.totalorder %s4042_s1, %s4036_s21 }
 0x2ef   : > { %v5523_v47 = vpop.permute.xlu1 %1410  ;;  %3857 = vmatprep.mubr.msk.f32.mxu0 %vm352_vm0, %v4026_v11 }
 0x2f0   : > { %p4045_p3 = por %p4044_p2, %p4043_p1 }
 0x2f1   : > { %v1793_v26 = vpop.permute.xlu0 %1792 }
 0x2f2   : > { %v2284_v54 = vsel %vm2258_vm6, %v2251_v55, %v1793_v26  ;;  %3858 = vmatmul.mubr.msk.f32.gmra.mxu0 %vm352_vm0, %v4027_v29  ;;  %v2153_v26 = vsel %vm2126_vm2, %v2120_v56, %v5511_v23  ;;  %p4046_p5 = pnand %p4045_p3, %p4039_p0 }
 0x2f3   : > { %v1919_v60 = vpop.permute.xlu1 %1918  ;;  %3860 = vmatprep.mubr.msk.f32.mxu0 %vm352_vm0, %v4028_v4  ;;  %v2186_v36 = vsel %vm2159_vm3, %v2153_v26, %v5523_v47  ;;  %v2154_v47 = vsel %vm2126_vm2, %v2121_v30, %v5519_v40 }
 0x2f4   : > { %v2316_v13 = vsel %vm2291_vm7, %v2283_v49, %v1919_v60 }
 0x2f5   : > { %v5534_v42 = vpop.permute.xlu0 %1412 }
 0x2f6   : > { %3861 = vmatmul.mubr.msk.f32.gmra.mxu0 %vm352_vm0, %v4029_v43 }
 0x2f7   : > { %v5542_v51 = vpop.permute.xlu1 %1538  ;;  %3863 = vmatprep.mubr.msk.f32.mxu0 %vm352_vm0, %v4030_v35 }
 0x2f8   : > { %v2219_v5 = vsel %vm2192_vm4, %v2186_v36, %v5542_v51  ;;  %v2187_v51 = vsel %vm2159_vm3, %v2154_v47, %v5534_v42 }
 0x2f9   : > { %v1921_v12 = vpop.permute.xlu0 %1920 }
 0x2fa   : > { %v2317_v17 = vsel %vm2291_vm7, %v2284_v54, %v1921_v12  ;;  %3864 = vmatmul.mubr.msk.f32.gmra.mxu0 %vm352_vm0, %v4031_v46 }
 0x2fb   : > { %v2047_v37 = vpop.permute.xlu1 %2046  ;;  %3866 = vmatprep.mubr.msk.f32.mxu0 %vm352_vm0, %v4032_v48 }
 0x2fc   : > { %v2349_v61 = vsel %vm2324_vm8, %v2316_v13, %v2047_v37 }
 0x2fd   : > { %3810 = vmatprep.mubr.msk.f32.mxu1 %vm2373_vm9, %v2349_v61  ;;  %v5560_v9 = vpop.permute.xlu0 %1158 }
 0x2fe   : > { %3867 = vmatmul.mubr.msk.f32.gmra.mxu0 %vm352_vm0, %v4033_v31  ;;  %v2122_v57 = vsel %vm352_vm0, %v5151_v44, %v5560_v9  ;;  %v3776_v31 = vpop.f32.mrf.mxu0 }
 0x2ff   : > { %v1541_v25 = vpop.permute.xlu1 %1540  ;;  %3869 = vmatprep.mubr.msk.f32.mxu0 %vm352_vm0, %v4034_v16 }
 0x300   : > { %v2220_v18 = vsel %vm2192_vm4, %v2187_v51, %v1541_v25 }
 0x301   : > { %v1667_v22 = vpop.permute.xlu0 %1666 }
 0x302   : > { %3870 = vmatmul.mubr.msk.f32.gmra.mxu0 %vm352_vm0, %v4035_v19  ;;  %v2252_v20 = vsel %vm2225_vm5, %v2219_v5, %v1667_v22 }
 0x303   : > { %v2049_v10 = vpop.permute.xlu1 %2048 }
 0x304   : > { %v2350_v0 = vsel %vm2324_vm8, %v2317_v17, %v2049_v10 }
 0x305   : > { %3811 = vmatmul.mubr.msk.f32.gmra.mxu1 %vm2373_vm9, %v2350_v0  ;;  %v5581_v33 = vpop.permute.xlu0 %1160 }
 0x306   : > { %v2123_v10 = vsel %vm352_vm0, %v5169_v34, %v5581_v33 }
 0x307   : > { %v1287_v2 = vpop.permute.xlu1 %1286 }
 0x308   : > { %v2155_v11 = vsel %vm2126_vm2, %v2122_v57, %v1287_v2 }
 0x309   : > { %v1669_v63 = vpop.permute.xlu0 %1668 }
 0x30a   : > { %v2253_v12 = vsel %vm2225_vm5, %v2220_v18, %v1669_v63  ;;  %v3782_v63 = vpop.f32.mrf.mxu1 }
 0x30b   : > { %v1795_v27 = vpop.permute.xlu1 %1794 }
 0x30c   : > { %v2285_v59 = vsel %vm2258_vm6, %v2252_v20, %v1795_v27 }
 0x30d   : > { %v1289_v32 = vpop.permute.xlu0 %1288 }
 0x30e   : > { %v2156_v9 = vsel %vm2126_vm2, %v2123_v10, %v1289_v32 }
 0x30f   : > { %v1415_v38 = vpop.permute.xlu1 %1414 }
 0x310   : > { %v2188_v6 = vsel %vm2159_vm3, %v2155_v11, %v1415_v38  ;;  %v2556_v38 = vpop.f32.mrf.mxu1 }
 0x311   : > { %v1797_v21 = vpop.permute.xlu0 %1796 }
 0x312   : > { %v2286_v14 = vsel %vm2258_vm6, %v2253_v12, %v1797_v21  ;;  %v3785_v21 = vpop.f32.mrf.mxu1 }
 0x313   : > { %v1923_v50 = vpop.permute.xlu1 %1922 }
 0x314   : > { %v2318_v28 = vsel %vm2291_vm7, %v2285_v59, %v1923_v50  ;;  %v2536_v50 = vpop.f32.mrf.mxu0 }
 0x315   : > { %v1417_v39 = vpop.permute.xlu0 %1416 }
 0x316   : > { %v2189_v43 = vsel %vm2159_vm3, %v2156_v9, %v1417_v39  ;;  %v3779_v26 = vpop.f32.mrf.mxu0 }
 0x317   : > { %v1543_v60 = vpop.permute.xlu1 %1542 }
 0x318   : > { %v2221_v22 = vsel %vm2192_vm4, %v2188_v6, %v1543_v60  ;;  %v2566_v60 = vpop.f32.mrf.mxu1 }
 0x319   : > { %v1925_v15 = vpop.permute.xlu0 %1924 }
 0x31a   : > { %v2319_v13 = vsel %vm2291_vm7, %v2286_v14, %v1925_v15 }
 0x31b   : > { %v2051_v7 = vpop.permute.xlu1 %2050 }
 0x31c   : > { %v2351_v53 = vsel %vm2324_vm8, %v2318_v28, %v2051_v7  ;;  %v5657_v7 = vld [vmem:[%s5866_s5] ss:$0 sm:$0xff] }
 0x31d   : > { %3813 = vmatprep.mubr.msk.f32.mxu1 %vm2373_vm9, %v2351_v53  ;;  %v1163_v23 = vpop.permute.xlu0 %1162  ;;  %v2572_v10 = vadd.f32 %v3785_v21, %v5657_v7 }
 0x31e   : > { %v2124_v56 = vsel %vm352_vm0, %v5225_v52, %v1163_v23  ;;  %v3788_v52 = vpop.f32.mrf.mxu1 }
 0x31f   : > { %v1545_v58 = vpop.permute.xlu1 %1544 }
 0x320   : > { %v2222_v35 = vsel %vm2192_vm4, %v2189_v43, %v1545_v58  ;;  %v2546_v58 = vpop.f32.mrf.mxu0  ;;  %v2702_v43 = vmax.f32 %v2572_v10, 0.0 }
 0x321   : > { %v1671_v49 = vpop.permute.xlu0 %1670 }
 0x322   : > { %v2254_v54 = vsel %vm2225_vm5, %v2221_v22, %v1671_v49 }
 0x323   : > { %v2053_v24 = vpop.permute.xlu1 %2052 }
 0x324   : > { %v2352_v1 = vsel %vm2324_vm8, %v2319_v13, %v2053_v24  ;;  %v2542_v24 = vadd.f32 %v3776_v31, %v5657_v7 }
 0x325   : > { %3814 = vmatmul.mubr.msk.f32.gmra.mxu1 %vm2373_vm9, %v2352_v1  ;;  %v1165_v37 = vpop.permute.xlu0 %1164  ;;  %v2576_v1 = vpop.f32.mrf.mxu1 }
 0x326   : > { %v2125_v5 = vsel %vm352_vm0, %v5247_v8, %v1165_v37  ;;  %v2537_v8 = vadd.f32 %v5657_v7, %v2536_v50  ;;  %v2577_v9 = vadd.f32 %v5657_v7, %v2576_v1 }
 0x327   : > { %v1291_v40 = vpop.permute.xlu1 %1290 }
 0x328   : > { %v2157_v36 = vsel %vm2126_vm2, %v2124_v56, %v1291_v40 }
 0x329   : > { %v1673_v41 = vpop.permute.xlu0 %1672 }
 0x32a   : > { %v2255_v46 = vsel %vm2225_vm5, %v2222_v35, %v1673_v41  ;;  %v2695_v41 = vmax.f32 %v2537_v8, 0.0  ;;  %v2703_v35 = vmax.f32 %v2577_v9, 0.0 }
 0x32b   : > { %v1799_v61 = vpop.permute.xlu1 %1798 }
 0x32c   : > { %v2287_v17 = vsel %vm2258_vm6, %v2254_v54, %v1799_v61  ;;  %v2547_v61 = vadd.f32 %v5657_v7, %v2546_v58 }
 0x32d   : > { %v1293_v42 = vpop.permute.xlu0 %1292 }
 0x32e   : > { %v2158_v59 = vsel %vm2126_vm2, %v2125_v5, %v1293_v42  ;;  %v2697_v57 = vmax.f32 %v2547_v61, 0.0 }
 0x32f   : > { %v1419_v45 = vpop.permute.xlu1 %1418 }
 0x330   : > { %v2190_v20 = vsel %vm2159_vm3, %v2157_v36, %v1419_v45  ;;  %v3791_v45 = vpop.f32.mrf.mxu1 }
 0x331   : > { %v1801_v62 = vpop.permute.xlu0 %1800 }
 0x332   : > { %v2288_v34 = vsel %vm2258_vm6, %v2255_v46, %v1801_v62  ;;  %v2696_v62 = vmax.f32 %v2542_v24, 0.0  ;;  %v2586_v11 = vpop.f32.mrf.mxu1 }
 0x333   : > { %v1927_v3 = vpop.permute.xlu1 %1926 }
 0x334   : > { %v2320_v4 = vsel %vm2291_vm7, %v2287_v17, %v1927_v3  ;;  %v2552_v3 = vadd.f32 %v3779_v26, %v5657_v7  ;;  %v3794_v22 = vpop.f32.mrf.mxu1 }
 0x335   : > { %v1421_v25 = vpop.permute.xlu0 %1420 }
 0x336   : > { %v2191_v53 = vsel %vm2159_vm3, %v2158_v59, %v1421_v25  ;;  %v2557_v25 = vadd.f32 %v5657_v7, %v2556_v38  ;;  %v2698_v6 = vmax.f32 %v2552_v3, 0.0  ;;  %v2602_v38 = vadd.f32 %v3794_v22, %v5657_v7 }
 0x337   : > { %v1547_v55 = vpop.permute.xlu1 %1546 }
 0x338   : > { %v2223_v28 = vsel %vm2192_vm4, %v2190_v20, %v1547_v55  ;;  %v2562_v55 = vadd.f32 %v3782_v63, %v5657_v7  ;;  %v2699_v54 = vmax.f32 %v2557_v25, 0.0  ;;  %v2587_v63 = vadd.f32 %v5657_v7, %v2586_v11 }
 0x339   : > { %v1929_v29 = vpop.permute.xlu0 %1928  ;;  %v2708_v56 = vmax.f32 %v2602_v38, 0.0 }
 0x33a   : > { %v2321_v33 = vsel %vm2291_vm7, %v2288_v34, %v1929_v29  ;;  %v2567_v29 = vadd.f32 %v5657_v7, %v2566_v60  ;;  %v2700_v17 = vmax.f32 %v2562_v55, 0.0  ;;  %v2592_v34 = vadd.f32 %v3791_v45, %v5657_v7 }
 0x33b   : > { %v2055_v44 = vpop.permute.xlu1 %2054 }
 0x33c   : > { %v2353_v0 = vsel %vm2324_vm8, %v2320_v4, %v2055_v44  ;;  %v2596_v4 = vpop.f32.mrf.mxu1  ;;  %v2701_v44 = vmax.f32 %v2567_v29, 0.0 }
 0x33d   : > { %3816 = vmatprep.mubr.msk.f32.mxu1 %vm2373_vm9, %v2353_v0  ;;  %v1549_v2 = vpop.permute.xlu0 %1548  ;;  %v2597_v31 = vadd.f32 %v5657_v7, %v2596_v4 }
 0x33e   : > { %v2224_v47 = vsel %vm2192_vm4, %v2191_v53, %v1549_v2  ;;  %v3797_v0 = vpop.f32.mrf.mxu1  ;;  %v2582_v2 = vadd.f32 %v3788_v52, %v5657_v7 }
 0x33f   : > { %v1675_v27 = vpop.permute.xlu1 %1674  ;;  %v2707_v21 = vmax.f32 %v2597_v31, 0.0 }
 0x340   : > { %v2256_v30 = vsel %vm2225_vm5, %v2223_v28, %v1675_v27  ;;  %v2606_v46 = vpop.f32.mrf.mxu1  ;;  %v2704_v27 = vmax.f32 %v2582_v2, 0.0 }
 0x341   : > { %v2057_v48 = vpop.permute.xlu0 %2056 }
 0x342   : > { %v2354_v32 = vsel %vm2324_vm8, %v2321_v33, %v2057_v48  ;;  %v2705_v48 = vmax.f32 %v2587_v63, 0.0 }
 0x343   : > { %v1677_v16 = vpop.permute.xlu1 %1676  ;;  %3817 = vmatmul.mubr.msk.f32.gmra.mxu1 %vm2373_vm9, %v2354_v32  ;;  %v2706_v32 = vmax.f32 %v2592_v34, 0.0 }
 0x344   : > { %v2257_v18 = vsel %vm2225_vm5, %v2224_v47, %v1677_v16 }
 0x345   : > { %v1803_v19 = vpop.permute.xlu0 %1802  ;;  %v3800_v33 = vpop.f32.mrf.mxu1 }
 0x346   : > { %v2289_v51 = vsel %vm2258_vm6, %v2256_v30, %v1803_v19  ;;  %v2607_v19 = vadd.f32 %v5657_v7, %v2606_v46  ;;  %v2622_v20 = vadd.f32 %v3800_v33, %v5657_v7 }
 0x347   : > { %v1805_v39 = vpop.permute.xlu1 %1804  ;;  %v2616_v16 = vpop.f32.mrf.mxu1 }
 0x348   : > { %v2290_v14 = vsel %vm2258_vm6, %v2257_v18, %v1805_v39  ;;  %v2612_v39 = vadd.f32 %v3797_v0, %v5657_v7  ;;  %v2709_v26 = vmax.f32 %v2607_v19, 0.0  ;;  %v2617_v36 = vadd.f32 %v5657_v7, %v2616_v16 }
 0x349   : > { %v1931_v15 = vpop.permute.xlu0 %1930  ;;  %v2712_v28 = vmax.f32 %v2622_v20, 0.0 }
 0x34a   : > { %v2322_v12 = vsel %vm2291_vm7, %v2289_v51, %v1931_v15  ;;  %v2710_v5 = vmax.f32 %v2612_v39, 0.0  ;;  %v2711_v15 = vmax.f32 %v2617_v36, 0.0 }
 0x34b   : > { %v1933_v23 = vpop.permute.xlu1 %1932 }
 0x34c   : > { %v2323_v37 = vsel %vm2291_vm7, %v2290_v14, %v1933_v23 }
 0x34d   : > { %v2059_v49 = vpop.permute.xlu0 %2058 }
 0x34e   : > { %v2355_v13 = vsel %vm2324_vm8, %v2322_v12, %v2059_v49 }
 0x34f   : > { %v2061_v40 = vpop.permute.xlu1 %2060  ;;  %3819 = vmatprep.mubr.msk.f32.mxu1 %vm2373_vm9, %v2355_v13 }
 0x350   : > { %v2356_v42 = vsel %vm2324_vm8, %v2323_v37, %v2061_v40 }
 0x351   : > { %3820 = vmatmul.mubr.msk.f32.gmra.mxu1 %vm2373_vm9, %v2356_v42 }
 0x352   : > { %3874 = vmatprep.mubr.msk.f32.mxu1 %vm352_vm0, %v2695_v41 }
 0x355   : > { %3875 = vmatmul.mubr.msk.f32.vlgmr.msra.gmra.mxu1 %vm352_vm0, %v2696_v62 }
 0x356   : > { %3877 = vmatprep.mubr.msk.f32.mxu1 %vm352_vm0, %v2697_v57 }
 0x359   : > { %3878 = vmatmul.mubr.msk.f32.gmra.mxu1 %vm352_vm0, %v2698_v6 }
 0x35a   : > { %3880 = vmatprep.mubr.msk.f32.mxu1 %vm352_vm0, %v2699_v54 }
 0x35d   : > { %3881 = vmatmul.mubr.msk.f32.gmra.mxu1 %vm352_vm0, %v2700_v17 }
 0x35e   : > { %3883 = vmatprep.mubr.msk.f32.mxu1 %vm352_vm0, %v2701_v44 }
 0x361   : > { %3884 = vmatmul.mubr.msk.f32.gmra.mxu1 %vm352_vm0, %v2702_v43 }
 0x362   : > { %3886 = vmatprep.mubr.msk.f32.mxu1 %vm352_vm0, %v2703_v35 }
 0x365   : > { %3887 = vmatmul.mubr.msk.f32.gmra.mxu1 %vm352_vm0, %v2704_v27  ;;  %v3803_v50 = vpop.f32.mrf.mxu1 }
 0x366   : > { %3889 = vmatprep.mubr.msk.f32.mxu1 %vm352_vm0, %v2705_v48  ;;  %v2632_v52 = vadd.f32 %v3803_v50, %v5657_v7 }
 0x367   : > { %v2626_v60 = vpop.f32.mrf.mxu1 }
 0x368   : > { %v2627_v59 = vadd.f32 %v5657_v7, %v2626_v60  ;;  %v2714_v30 = vmax.f32 %v2632_v52, 0.0 }
 0x369   : > { %3890 = vmatmul.mubr.msk.f32.gmra.mxu1 %vm352_vm0, %v2706_v32 }
 0x36a   : > { %3892 = vmatprep.mubr.msk.f32.mxu1 %vm352_vm0, %v2707_v21  ;;  %v2713_v53 = vmax.f32 %v2627_v59, 0.0 }
 0x36d   : > { %3893 = vmatmul.mubr.msk.f32.gmra.mxu1 %vm352_vm0, %v2708_v56 }
 0x36e   : > { %3895 = vmatprep.mubr.msk.f32.mxu1 %vm352_vm0, %v2709_v26 }
 0x371   : > { %3896 = vmatmul.mubr.msk.f32.gmra.mxu1 %vm352_vm0, %v2710_v5 }
 0x372   : > { %3898 = vmatprep.mubr.msk.f32.mxu1 %vm352_vm0, %v2711_v15 }
 0x375   : > { %3899 = vmatmul.mubr.msk.f32.gmra.mxu1 %vm352_vm0, %v2712_v28 }
 0x376   : > { %3901 = vmatprep.mubr.msk.f32.mxu1 %vm352_vm0, %v2713_v53 }
 0x379   : > { %3902 = vmatmul.mubr.msk.f32.gmra.mxu1 %vm352_vm0, %v2714_v30 }
 0x385   : > { %v3806_v23 = vpop.f32.mrf.mxu1 }
 0x386   : > { %v2642_v8 = vadd.f32 %v3806_v23, %v5657_v7  ;;  %v3826_v55 = vpop.f32.mrf.mxu0 }
 0x387   : > { %v2636_v47 = vpop.f32.mrf.mxu1 }
 0x388   : > { %v2637_v51 = vadd.f32 %v5657_v7, %v2636_v47  ;;  %v2716_v18 = vmax.f32 %v2642_v8, 0.0  ;;  %v2795_v22 = vpop.f32.mrf.mxu0 }
 0x38a   : > { %v2715_v58 = vmax.f32 %v2637_v51, 0.0  ;;  %v3829_v54 = vpop.f32.mrf.mxu0 }
 0x38c   : > { %3904 = vmatprep.mubr.msk.f32.mxu1 %vm352_vm0, %v2715_v58  ;;  %v2805_v29 = vpop.f32.mrf.mxu0 }
 0x38d   : > { %3905 = vmatmul.mubr.msk.f32.gmra.mxu1 %vm352_vm0, %v2716_v18 }
 0x38e   : > { %v3832_v17 = vpop.f32.mrf.mxu0 }
 0x390   : > { %v2815_v10 = vpop.f32.mrf.mxu0 }
 0x392   : > { %v3835_v0 = vpop.f32.mrf.mxu0 }
 0x394   : > { %v2825_v63 = vpop.f32.mrf.mxu0 }
 0x396   : > { %v3838_v46 = vpop.f32.mrf.mxu0 }
 0x398   : > { %v2835_v34 = vpop.f32.mrf.mxu0 }
 0x39a   : > { %v3841_v38 = vpop.f32.mrf.mxu0 }
 0x3a5   : > { %v3809_v12 = vpop.f32.mrf.mxu1 }
 0x3a6   : > { %v2652_v49 = vadd.f32 %v3809_v12, %v5657_v7 }
 0x3a7   : > { %v2646_v14 = vpop.f32.mrf.mxu1 }
 0x3a8   : > { %v2647_v13 = vadd.f32 %v5657_v7, %v2646_v14  ;;  %v2718_v1 = vmax.f32 %v2652_v49, 0.0 }
 0x3aa   : > { %v2717_v24 = vmax.f32 %v2647_v13, 0.0 }
 0x3ac   : > { %3907 = vmatprep.mubr.msk.f32.mxu1 %vm352_vm0, %v2717_v24 }
 0x3ad   : > { %3908 = vmatmul.mubr.msk.f32.gmra.mxu1 %vm352_vm0, %v2718_v1 }
 0x3c5   : > { %v3812_v37 = vpop.f32.mrf.mxu1 }
 0x3c6   : > { %v2662_v40 = vadd.f32 %v3812_v37, %v5657_v7 }
 0x3c7   : > { %v2656_v41 = vpop.f32.mrf.mxu1 }
 0x3c8   : > { %v2657_v61 = vadd.f32 %v5657_v7, %v2656_v41  ;;  %v2720_v45 = vmax.f32 %v2662_v40, 0.0 }
 0x3ca   : > { %v2719_v42 = vmax.f32 %v2657_v61, 0.0 }
 0x3cc   : > { %3910 = vmatprep.mubr.msk.f32.mxu1 %vm352_vm0, %v2719_v42 }
 0x3cd   : > { %3911 = vmatmul.mubr.msk.f32.gmra.mxu1 %vm352_vm0, %v2720_v45 }
 0x3e5   : > { %v3815_v62 = vpop.f32.mrf.mxu1 }
 0x3e6   : > { %v2672_v3 = vadd.f32 %v3815_v62, %v5657_v7 }
 0x3e7   : > { %v2666_v57 = vpop.f32.mrf.mxu1 }
 0x3e8   : > { %v2667_v25 = vadd.f32 %v5657_v7, %v2666_v57  ;;  %v2722_v6 = vmax.f32 %v2672_v3, 0.0 }
 0x3ea   : > { %v2721_v11 = vmax.f32 %v2667_v25, 0.0 }
 0x3ec   : > { %3913 = vmatprep.mubr.msk.f32.mxu1 %vm352_vm0, %v2721_v11 }
 0x3ed   : > { %3914 = vmatmul.mubr.msk.f32.gmra.mxu1 %vm352_vm0, %v2722_v6 }
 0x403   : > { %v3818_v4 = vpop.f32.mrf.mxu1 }
 0x404   : > { %v2682_v44 = vadd.f32 %v3818_v4, %v5657_v7 }
 0x405   : > { %v2676_v9 = vpop.f32.mrf.mxu1 }
 0x406   : > { %v2677_v43 = vadd.f32 %v5657_v7, %v2676_v9  ;;  %v2724_v35 = vmax.f32 %v2682_v44, 0.0 }
 0x408   : > { %v2723_v2 = vmax.f32 %v2677_v43, 0.0 }
 0x40a   : > { %3916 = vmatprep.mubr.msk.f32.mxu1 %vm352_vm0, %v2723_v2 }
 0x40b   : > { %3917 = vmatmul.mubr.msk.f32.gmra.mxu1 %vm352_vm0, %v2724_v35 }
 0x411   : > { %v3821_v27 = vpop.f32.mrf.mxu1 }
 0x412   : > { %v2692_v33 = vadd.f32 %v3821_v27, %v5657_v7 }
 0x413   : > { %v2686_v48 = vpop.f32.mrf.mxu1 }
 0x414   : > { %v2687_v31 = vadd.f32 %v5657_v7, %v2686_v48  ;;  %v2726_v19 = vmax.f32 %v2692_v33, 0.0  ;;  %v2845_v7 = vpop.f32.mrf.mxu0 }
 0x415   : > { %v3876_v32 = vpop.f32.mrf.mxu1 }
 0x416   : > { %v2725_v16 = vmax.f32 %v2687_v31, 0.0  ;;  %v3122_v21 = vadd.f32 %v3876_v32, %v3826_v55  ;;  %v3844_v20 = vpop.f32.mrf.mxu0 }
 0x417   : > { %v3116_v50 = vpop.f32.mrf.mxu1 }
 0x418   : > { %3276 = vst.msk [vmem:[%s5736_s11 + $0x8] sm:$0xff] %vm2192_vm4, %v3122_v21  ;;  %v3117_v56 = vadd.f32 %v3116_v50, %v2795_v22  ;;  %3919 = vmatprep.mubr.msk.f32.mxu1 %vm352_vm0, %v2725_v16  ;;  %v2855_v53 = vpop.f32.mrf.mxu0 }
 0x419   : > { %v3879_v39 = vpop.f32.mrf.mxu1  ;;  %3920 = vmatmul.mubr.msk.f32.gmra.mxu1 %vm352_vm0, %v2726_v19 }
 0x41a   : > { %3275 = vst.msk [vmem:[%s5736_s11] sm:$0xff] %vm2192_vm4, %v3117_v56  ;;  %v3132_v26 = vadd.f32 %v3879_v39, %v3829_v54  ;;  %v3847_v51 = vpop.f32.mrf.mxu0 }
 0x41b   : > { %v3126_v36 = vpop.f32.mrf.mxu1 }
 0x41c   : > { %3278 = vst.msk [vmem:[%s5736_s11 + $0x18] sm:$0xff] %vm2192_vm4, %v3132_v26  ;;  %v3127_v60 = vadd.f32 %v3126_v36, %v2805_v29  ;;  %v2865_v14 = vpop.f32.mrf.mxu0 }
 0x41d   : > { %v3882_v5 = vpop.f32.mrf.mxu1 }
 0x41e   : > { %3277 = vst.msk [vmem:[%s5736_s11 + $0x10] sm:$0xff] %vm2192_vm4, %v3127_v60  ;;  %v3142_v15 = vadd.f32 %v3882_v5, %v3832_v17  ;;  %v3850_v40 = vpop.f32.mrf.mxu0 }
 0x41f   : > { %v3136_v59 = vpop.f32.mrf.mxu1 }
 0x420   : > { %3280 = vst.msk [vmem:[%s5736_s11 + $0x28] sm:$0xff] %vm2192_vm4, %v3142_v15  ;;  %v3137_v28 = vadd.f32 %v3136_v59, %v2815_v10  ;;  %v2875_v62 = vpop.f32.mrf.mxu0 }
 0x421   : > { %v3885_v52 = vpop.f32.mrf.mxu1 }
 0x422   : > { %3279 = vst.msk [vmem:[%s5736_s11 + $0x20] sm:$0xff] %vm2192_vm4, %v3137_v28  ;;  %v3152_v30 = vadd.f32 %v3885_v52, %v3835_v0  ;;  %v3853_v6 = vpop.f32.mrf.mxu0 }
 0x423   : > { %v3146_v23 = vpop.f32.mrf.mxu1 }
 0x424   : > { %3282 = vst.msk [vmem:[%s5736_s11 + $0x38] sm:$0xff] %vm2192_vm4, %v3152_v30  ;;  %v3147_v8 = vadd.f32 %v3146_v23, %v2825_v63  ;;  %v2885_v17 = vpop.f32.mrf.mxu0 }
 0x425   : > { %v3888_v47 = vpop.f32.mrf.mxu1 }
 0x426   : > { %3281 = vst.msk [vmem:[%s5736_s11 + $0x30] sm:$0xff] %vm2192_vm4, %v3147_v8  ;;  %v3162_v58 = vadd.f32 %v3888_v47, %v3838_v46  ;;  %v3856_v9 = vpop.f32.mrf.mxu0 }
 0x427   : > { %v3156_v18 = vpop.f32.mrf.mxu1 }
 0x428   : > { %3284 = vst.msk [vmem:[%s5736_s11 + $0x48] sm:$0xff] %vm2192_vm4, %v3162_v58  ;;  %v3157_v12 = vadd.f32 %v3156_v18, %v2835_v34  ;;  %v2895_v43 = vpop.f32.mrf.mxu0 }
 0x429   : > { %v3891_v49 = vpop.f32.mrf.mxu1 }
 0x42a   : > { %3283 = vst.msk [vmem:[%s5736_s11 + $0x40] sm:$0xff] %vm2192_vm4, %v3157_v12  ;;  %v3172_v13 = vadd.f32 %v3891_v49, %v3841_v38  ;;  %v3859_v46 = vpop.f32.mrf.mxu0 }
 0x42b   : > { %v3166_v24 = vpop.f32.mrf.mxu1 }
 0x42c   : > { %3286 = vst.msk [vmem:[%s5736_s11 + $0x58] sm:$0xff] %vm2192_vm4, %v3172_v13  ;;  %v3167_v1 = vadd.f32 %v3166_v24, %v2845_v7  ;;  %v2905_v34 = vpop.f32.mrf.mxu0 }
 0x42d   : > { %v3894_v37 = vpop.f32.mrf.mxu1 }
 0x42e   : > { %3285 = vst.msk [vmem:[%s5736_s11 + $0x50] sm:$0xff] %vm2192_vm4, %v3167_v1  ;;  %v3182_v41 = vadd.f32 %v3894_v37, %v3844_v20  ;;  %v3862_v32 = vpop.f32.mrf.mxu0 }
 0x42f   : > { %v3176_v61 = vpop.f32.mrf.mxu1 }
 0x430   : > { %3288 = vst.msk [vmem:[%s5736_s11 + $0x68] sm:$0xff] %vm2192_vm4, %v3182_v41  ;;  %v3177_v42 = vadd.f32 %v3176_v61, %v2855_v53  ;;  %v2915_v16 = vpop.f32.mrf.mxu0 }
 0x431   : > { %v3897_v45 = vpop.f32.mrf.mxu1 }
 0x432   : > { %3287 = vst.msk [vmem:[%s5736_s11 + $0x60] sm:$0xff] %vm2192_vm4, %v3177_v42  ;;  %v3192_v3 = vadd.f32 %v3897_v45, %v3847_v51  ;;  %v3865_v56 = vpop.f32.mrf.mxu0 }
 0x433   : > { %v3186_v57 = vpop.f32.mrf.mxu1 }
 0x434   : > { %3290 = vst.msk [vmem:[%s5736_s11 + $0x78] sm:$0xff] %vm2192_vm4, %v3192_v3  ;;  %v3187_v25 = vadd.f32 %v3186_v57, %v2865_v14  ;;  %v2925_v7 = vpop.f32.mrf.mxu0 }
 0x435   : > { %v3900_v11 = vpop.f32.mrf.mxu1 }
 0x436   : > { %3289 = vst.msk [vmem:[%s5736_s11 + $0x70] sm:$0xff] %vm2192_vm4, %v3187_v25  ;;  %v3202_v55 = vadd.f32 %v3900_v11, %v3850_v40  ;;  %v3868_v5 = vpop.f32.mrf.mxu0 }
 0x437   : > { %v3196_v22 = vpop.f32.mrf.mxu1 }
 0x438   : > { %3292 = vst.msk [vmem:[%s5736_s11 + $0x88] sm:$0xff] %vm2192_vm4, %v3202_v55  ;;  %v3197_v54 = vadd.f32 %v3196_v22, %v2875_v62  ;;  %v2935_v15 = vpop.f32.mrf.mxu0 }
 0x439   : > { %v3903_v29 = vpop.f32.mrf.mxu1 }
 0x43a   : > { %3291 = vst.msk [vmem:[%s5736_s11 + $0x80] sm:$0xff] %vm2192_vm4, %v3197_v54  ;;  %v3212_v10 = vadd.f32 %v3903_v29, %v3853_v6  ;;  %v3871_v53 = vpop.f32.mrf.mxu0 }
 0x43b   : > { %v3206_v4 = vpop.f32.mrf.mxu1 }
 0x43c   : > { %3294 = vst.msk [vmem:[%s5736_s11 + $0x98] sm:$0xff] %vm2192_vm4, %v3212_v10  ;;  %v3207_v44 = vadd.f32 %v3206_v4, %v2885_v17  ;;  %v2945_v8 = vpop.f32.mrf.mxu0 }
 0x43e   : > { %3293 = vst.msk [vmem:[%s5736_s11 + $0x90] sm:$0xff] %vm2192_vm4, %v3207_v44 }
 0x44d   : > { %v3906_v0 = vpop.f32.mrf.mxu1 }
 0x44e   : > { %v3222_v2 = vadd.f32 %v3906_v0, %v3856_v9 }
 0x44f   : > { %v3216_v35 = vpop.f32.mrf.mxu1 }
 0x450   : > { %3296 = vst.msk [vmem:[%s5736_s11 + $0xa8] sm:$0xff] %vm2192_vm4, %v3222_v2  ;;  %v3217_v63 = vadd.f32 %v3216_v35, %v2895_v43 }
 0x452   : > { %3295 = vst.msk [vmem:[%s5736_s11 + $0xa0] sm:$0xff] %vm2192_vm4, %v3217_v63 }
 0x46d   : > { %v3909_v27 = vpop.f32.mrf.mxu1 }
 0x46e   : > { %v3232_v33 = vadd.f32 %v3909_v27, %v3859_v46 }
 0x46f   : > { %v3226_v48 = vpop.f32.mrf.mxu1 }
 0x470   : > { %3298 = vst.msk [vmem:[%s5736_s11 + $0xb8] sm:$0xff] %vm2192_vm4, %v3232_v33  ;;  %v3227_v31 = vadd.f32 %v3226_v48, %v2905_v34 }
 0x472   : > { %3297 = vst.msk [vmem:[%s5736_s11 + $0xb0] sm:$0xff] %vm2192_vm4, %v3227_v31 }
 0x48d   : > { %v3912_v38 = vpop.f32.mrf.mxu1 }
 0x48e   : > { %v3242_v21 = vadd.f32 %v3912_v38, %v3862_v32 }
 0x48f   : > { %v3236_v19 = vpop.f32.mrf.mxu1 }
 0x490   : > { %3300 = vst.msk [vmem:[%s5736_s11 + $0xc8] sm:$0xff] %vm2192_vm4, %v3242_v21  ;;  %v3237_v50 = vadd.f32 %v3236_v19, %v2915_v16 }
 0x492   : > { %3299 = vst.msk [vmem:[%s5736_s11 + $0xc0] sm:$0xff] %vm2192_vm4, %v3237_v50 }
 0x4ad   : > { %v3915_v39 = vpop.f32.mrf.mxu1 }
 0x4ae   : > { %v3252_v26 = vadd.f32 %v3915_v39, %v3865_v56 }
 0x4af   : > { %v3246_v36 = vpop.f32.mrf.mxu1 }
 0x4b0   : > { %3302 = vst.msk [vmem:[%s5736_s11 + $0xd8] sm:$0xff] %vm2192_vm4, %v3252_v26  ;;  %v3247_v60 = vadd.f32 %v3246_v36, %v2925_v7 }
 0x4b2   : > { %3301 = vst.msk [vmem:[%s5736_s11 + $0xd0] sm:$0xff] %vm2192_vm4, %v3247_v60 }
 0x4cb   : > { %v3918_v20 = vpop.f32.mrf.mxu1 }
 0x4cc   : > { %v3262_v59 = vadd.f32 %v3918_v20, %v3868_v5 }
 0x4cd   : > { %v3256_v28 = vpop.f32.mrf.mxu1 }
 0x4ce   : > { %3304 = vst.msk [vmem:[%s5736_s11 + $0xe8] sm:$0xff] %vm2192_vm4, %v3262_v59  ;;  %v3257_v52 = vadd.f32 %v3256_v28, %v2935_v15 }
 0x4d0   : > { %3303 = vst.msk [vmem:[%s5736_s11 + $0xe0] sm:$0xff] %vm2192_vm4, %v3257_v52 }
 0x4d9   : > { %v3921_v30 = vpop.f32.mrf.mxu1 }
 0x4da   : > { %v3272_v23 = vadd.f32 %v3921_v30, %v3871_v53 }
 0x4db   : > { %v3266_v47 = vpop.f32.mrf.mxu1 }
 0x4dc   : > { %3306 = vst.msk [vmem:[%s5736_s11 + $0xf8] sm:$0xff] %vm2192_vm4, %v3272_v23  ;;  %v3267_v51 = vadd.f32 %v3266_v47, %v2945_v8 }
 0x4de   : > { %3305 = vst.msk [vmem:[%s5736_s11 + $0xf0] sm:$0xff] %vm2192_vm4, %v3267_v51 }
 0x4df   : > { %4049 = shalt.err (!%p4046_p5)
}
 0x4e0   : > { %s4050_s15 = scalar_lea.hbm %s5805_s10, 4096  ;;  %s4054_s18 = scalar_lea.hbm %s5869_s8, 8192 }
 0x4e1   : > { %p4051_p6 = scmp.ne.s32.totalorder %s5805_s10, %s4050_s15  ;;  %p4055_p10 = scmp.lt.s32.totalorder %s5805_s10, %s5869_s8 }
 0x4e2   : > { %p4056_p11 = scmp.lt.s32.totalorder %s4054_s18, %s4050_s15 }
 0x4e3   : > { %p4052_p7 = pnand %p4051_p6, %p4210_p4 }
 0x4e4   : > { %p4057_p12 = por %p4056_p11, %p4055_p10 }
 0x4e5   : > { %p4053_p9 = pneg %p4052_p7 }
 0x4e7   : > { %p4058_p13 = pnand %p4057_p12, %p4053_p9 }
 0x4e9   : > { %4061 = shalt.err (!%p4058_p13)
}
 0x4ea   : > { %s4124_s21 = smov 128  }
 0x4eb   : > { %3940 = dma.vmem_to_hbm [thread:$0]  (%p4210_p4), %s5809_s19, 4096, %s5805_s10, %s5815_s29, %s4124_s21, %s4124_s21, %s4119_s22  }
 0x4ec PF: > { %p3946_p0 = scmp.ge.s32.totalorder %s4112_s9, 2  ;;  %s3339_s13 = sand.u32 1, %s4092_s26  }
 0x4ed   : > { %s3340_s24 = scalar_lea.sflag [#allocation6], %s3339_s13 }
 0x4ee   : > { %p3943_p1 = pnand %p3946_p0, %p4217_p8 }
 0x4f0   : > { %p3944_p2 = pneg %p3943_p1 }
 0x4f2   : > { %4087 = dma.done.wait (%p3944_p2), %s3340_s24, 4096  }
 0x4f3   : > { %4089 = vsyncadd (%p3944_p2), %s3340_s24, 4294963200  ;;  %s21_s9 = sadd.s32 1, %s4112_s9   ;;  %s5872_s26 = smov %s4096_s27 }
 0x4f4   : > { %p18_p3 = scmp.ge.s32.totalorder %s21_s9, 4   ;;  %s5873_s27 = smov %s4100_s28 }
 0x4f5   : > { %s5874_s28 = smov %s4223_s17  ;;  %s5875_s29 = smov %s4108_s30 }
 0x4f6   : > { %s5876_s30 = smov %s5878_s12  ;;  %20 = sbr.rel (!%p18_p3) target bundleno = 4 (0x4), region = 87 }
 0x4fb   :  { %3345 = vsyncpa [#allocation6], 1 }
 0x4fc   :  { %3347 = vsyncpa [#allocation6 + $0x1], 1 }
 0x4fd   :  { %3348 = vsyncmov [#allocation4] }
 0x500   :  { %s3349_s14 = vpop.sfrf %3348 }
 0x501   :  { %p3562_p4 = scmp.ne.s32.totalorder %s3349_s14, 0 }
 0x503   :  { %3353 = shalt.err (%p3562_p4)  }
 0x504   :  { %3355 = vsyncmov [#allocation4 + $0x1] }
 0x507   :  { %s3356_s16 = vpop.sfrf %3355 }
 0x508   :  { %p3563_p8 = scmp.ne.s32.totalorder %s3356_s16, 0 }
 0x50a   :  { %3360 = shalt.err (%p3563_p8)  }

</bundles_post_ra>
